<compile_context>
chip_gen: v7x
topology: tpu7x:2x2x1
jax: 0.10.0
libtpu: 0.0.40
codegen_flags: <defaults>
</compile_context>

<pallas_src>
import functools

import jax
import jax.numpy as jnp
from jax import lax
from jax.experimental import pallas as pl
from jax.experimental.pallas import tpu as pltpu


# ----------------------------- Pallas kernel --------------------------------
def _fused_conv_relu_lrn_kernel(x_ref, w_ref, b_ref, band_ref, o_ref, *,
                                kh, stride, hpp, ho, wo_pad, use_lrn, lrn_k):
    # x_ref:    (s*Hpp, Wo_pad, kw*Cin)  one packed image (bf16). Row layout is
    #           phase-major space-to-depth: packed row (i % s)*Hpp + (i // s) + r
    #           holds padded-image row i + r*s, so every tap slice is contiguous.
    # w_ref:    (KH, kw*Cin, Cout_pad)   per-row-tap weight slabs (bf16, resident)
    # b_ref:    (1, Cout_pad)            f32 bias row
    # band_ref: (Cout_pad, Cout_pad)     LRN band, alpha/size folded in (bf16, resident)
    # o_ref:    (Ho*Wo_pad, Cout_pad)    f32
    m = ho * wo_pad
    kwc = w_ref.shape[1]
    cp = w_ref.shape[2]

    acc = jnp.zeros((m, cp), jnp.float32)
    # Only KH dots; contraction K = kw*Cin (lane-dense), f32 accumulation on the MXU.
    for i in range(kh):
        off = (i % stride) * hpp + (i // stride)      # static Python ints
        xs = x_ref[off:off + ho]                      # (ho, wo_pad, kwc) contiguous view
        acc = acc + jnp.dot(xs.reshape(m, kwc), w_ref[i],
                            preferred_element_type=jnp.float32)

    y = jnp.maximum(acc + b_ref[...], 0.0)            # bias + ReLU (lane-dense Cout_pad)

    if use_lrn:
        # PyTorch F.local_response_norm: denom = (k + alpha/size * window_sum(y^2))^0.75
        # alpha/size pre-folded into band_ref; padded channels are exactly zero so they
        # cannot contaminate real channels.
        # TODO(synk): for cout_pad >= 256 replace the band matmul with ~5 pltpu.roll
        # shifted adds of y*y along the channel axis (XLU); at cout_pad=128 it is negligible.
        sq = (y * y).astype(band_ref.dtype)
        base = lrn_k + jnp.dot(sq, band_ref[...], preferred_element_type=jnp.float32)
        # base**(-0.75) via rsqrt/sqrt chain (exact for beta=0.75): EUP ops, no pow/divide.
        inv = lax.rsqrt(base) * lax.rsqrt(jnp.sqrt(base))
        y = y * inv

    o_ref[...] = y.astype(o_ref.dtype)


# ------------------------------ host wrapper ---------------------------------
class AlexConvBlockPallas:
    """Conv2d(bias=True) + ReLU + optional LRN(size=5, k=2.0). NCHW in / NCHW out."""

    LRN_SIZE = 5
    LRN_ALPHA = 1e-4
    LRN_BETA = 0.75          # rsqrt chain in the kernel assumes this value
    LRN_K = 2.0

    def __init__(self, in_channels, out_channels, kernel_size, stride, padding,
                 use_lrn, *, key):
        assert self.LRN_BETA == 0.75, "kernel's rsqrt/sqrt chain assumes beta == 0.75"
        self.cin = in_channels
        self.cout = out_channels
        self.kh = self.kw = kernel_size
        self.stride = stride
        self.padding = padding
        self.use_lrn = use_lrn
        # Lane-pad the output channel dim to a multiple of 128 (lane-dense stores).
        self.cout_pad = pl.cdiv(out_channels, 128) * 128

        kw_key, kb_key = jax.random.split(key)
        fan_in = in_channels * kernel_size * kernel_size
        bound = 1.0 / (fan_in ** 0.5)
        # Deterministic parameter init (uniform, PyTorch-like bounds), original layout
        # kept for the reference check.
        self.weight = jax.random.uniform(
            kw_key, (out_channels, in_channels, kernel_size, kernel_size),
            jnp.float32, -bound, bound)
        self.bias = jax.random.uniform(kb_key, (out_channels,), jnp.float32,
                                       -bound, bound)

        # ---- kernel-friendly parameter layouts, built once (not per call) ----
        cp = self.cout_pad
        # (Cout, Cin, KH, KW) -> (KH, KW*Cin, Cout_pad) bf16 slabs, zero-padded on Cout.
        # Lane index j*Cin + ch matches the host-packed input layout below.
        w_slab = jnp.transpose(self.weight, (2, 3, 1, 0)).reshape(
            kernel_size, kernel_size * in_channels, out_channels)
        self.w_slab = jnp.pad(
            w_slab, ((0, 0), (0, 0), (0, cp - out_channels))).astype(jnp.bfloat16)
        self.b_row = jnp.pad(self.bias, (0, cp - out_channels)).reshape(1, cp)

        # LRN banded channel-window matrix at the padded size, padded channels'
        # rows/cols zeroed, alpha/size scale folded in; stored bf16 (k=2 dominates).
        half = self.LRN_SIZE // 2
        idx = jnp.arange(cp)
        band = (jnp.abs(idx[:, None] - idx[None, :]) <= half).astype(jnp.float32)
        valid = (idx < out_channels).astype(jnp.float32)
        band = band * valid[:, None] * valid[None, :]
        self.band = (band * (self.LRN_ALPHA / self.LRN_SIZE)).astype(jnp.bfloat16)

    def __call__(self, x):
        n, cin, h, w = x.shape
        s, p = self.stride, self.padding
        kh, kw = self.kh, self.kw
        hp, wp = h + 2 * p, w + 2 * p
        ho = (hp - kh) // s + 1
        wo = (wp - kw) // s + 1
        wo_pad = pl.cdiv(wo, 8) * 8          # sublane-aligned output columns
        hpp = pl.cdiv(hp, s)                 # rows per stride phase plane
        kwc = kw * cin
        m = ho * wo_pad
        cp = self.cout_pad

        # NCHW -> NHWC plus the spatial zero-pad of the raw input.
        xp = jnp.transpose(x, (0, 2, 3, 1))
        if p > 0:
            xp = jnp.pad(xp, ((0, 0), (p, p), (p, p), (0, 0)))

        # Fold the kw window AND the W-stride into the minor (lane) axis:
        # (N, Hp, Wo, kw*Cin); output column c holds input columns c*s .. c*s+kw-1.
        # HBM inflation is only ~kw (not kh*kw), and the packed image is bf16.
        cols = [xp[:, :, j:j + (wo - 1) * s + 1:s, :] for j in range(kw)]
        xpk = jnp.concatenate(cols, axis=-1)
        if wo_pad > wo:
            xpk = jnp.pad(xpk, ((0, 0), (0, 0), (0, wo_pad - wo), (0, 0)))
        # H space-to-depth by the stride: phase-major (N, s*Hpp, Wo_pad, kw*Cin) so all
        # in-kernel tap slices are contiguous on the leading axis (no strided pl.ds).
        if s * hpp > hp:
            xpk = jnp.pad(xpk, ((0, 0), (0, s * hpp - hp), (0, 0), (0, 0)))
        xpk = (xpk.reshape(n, hpp, s, wo_pad, kwc)
                  .transpose(0, 2, 1, 3, 4)
                  .reshape(n, s * hpp, wo_pad, kwc)
                  .astype(jnp.bfloat16))

        kernel = functools.partial(
            _fused_conv_relu_lrn_kernel,
            kh=kh, stride=s, hpp=hpp, ho=ho, wo_pad=wo_pad,
            use_lrn=self.use_lrn, lrn_k=self.LRN_K)

        # TODO(synk): on v7x (64 MiB VMEM) with large spatial inputs, add a second
        # 'parallel' grid axis tiling Ho (with halo rows) to bound the per-step VMEM
        # footprint and feed both TensorCores when N is small; unnecessary at these shapes.
        out = pl.pallas_call(
            kernel,
            out_shape=jax.ShapeDtypeStruct((n, m, cp), jnp.float32),
            grid_spec=pltpu.PrefetchScalarGridSpec(
                num_scalar_prefetch=0,
                grid=(n,),                                   # parallel -> megacore sharding
                in_specs=[
                    # one packed image per grid step (lane-dense minor dim = kw*Cin)
                    pl.BlockSpec((None, s * hpp, wo_pad, kwc), lambda b: (b, 0, 0, 0)),
                    # constant index_maps: weights / bias / band stay VMEM-resident
                    pl.BlockSpec((kh, kwc, cp), lambda b: (0, 0, 0)),
                    pl.BlockSpec((1, cp), lambda b: (0, 0)),
                    pl.BlockSpec((cp, cp), lambda b: (0, 0)),
                ],
                out_specs=pl.BlockSpec((None, m, cp), lambda b: (b, 0, 0)),
            ),
            compiler_params=pltpu.CompilerParams(
                dimension_semantics=("parallel",)),
        )(xpk, self.w_slab, self.b_row, self.band)

        # Drop lane padding (Cout) and sublane padding (Wo), back to NCHW.
        out = out.reshape(n, ho, wo_pad, cp)[:, :, :wo, :self.cout]
        return jnp.transpose(out, (0, 3, 1, 2))


# ------------------------------ pure-JAX reference ---------------------------
def _reference(x, weight, bias, stride, padding, use_lrn):
    y = lax.conv_general_dilated(
        x, weight, window_strides=(stride, stride),
        padding=[(padding, padding), (padding, padding)],
        dimension_numbers=("NCHW", "OIHW", "NCHW"))
    y = y + bias[None, :, None, None]
    y = jnp.maximum(y, 0.0)
    if use_lrn:
        size, alpha, beta, k = 5, 1e-4, 0.75, 2.0
        sq = y * y
        sq_p = jnp.pad(sq, ((0, 0), (size // 2, (size - 1) // 2), (0, 0), (0, 0)))
        wsum = sum(sq_p[:, c:c + y.shape[1]] for c in range(size))
        y = y / jnp.power(k + (alpha / size) * wsum, beta)
    return y


# ----------------------------------- main ------------------------------------
if __name__ == "__main__":
    key = jax.random.PRNGKey(0)
    k_x, k_params = jax.random.split(key)

    # Small AlexNet-block-like shapes: N=2, Cin=4, Cout=8 on 16x16 (plus a 14x14 crop
    # to exercise Wo padding and strided configs to exercise the space-to-depth path).
    x = jax.random.normal(k_x, (2, 4, 16, 16), jnp.float32)

    configs = [
        # (kernel_size, stride, padding, use_lrn, input)
        (3, 1, 1, True,  x),
        (3, 1, 1, False, x),
        (3, 2, 1, True,  x),
        (3, 1, 1, True,  x[:, :, :14, :14]),   # wo=14 -> wo_pad=16
        (5, 2, 2, True,  x),
    ]

    ok = True
    for (ksz, s, p, use_lrn, xin) in configs:
        block = AlexConvBlockPallas(in_channels=4, out_channels=8, kernel_size=ksz,
                                    stride=s, padding=p, use_lrn=use_lrn,
                                    key=k_params)
        out = jax.block_until_ready(block(xin))
        ref = _reference(xin, block.weight, block.bias, s, p, use_lrn)
        if out.shape != ref.shape:
            ok = False
            continue
        # bf16 MXU operands with f32 accumulation -> loosened tolerance.
        if not jnp.allclose(out, ref, atol=5e-2, rtol=5e-2):
            ok = False

    if ok:
        print("KERNEL_OK")
</pallas_src>

<mosaic_0001>
module attributes {stable_mosaic.version = 11 : i64} {
  func.func @_fused_conv_relu_lrn_kernel(%arg0: i32, %arg1: memref<1x18x16x12xbf16, #tpu.memory_space<vmem>>, %arg2: memref<3x12x128xbf16, #tpu.memory_space<vmem>>, %arg3: memref<1x128xf32, #tpu.memory_space<vmem>>, %arg4: memref<128x128xbf16, #tpu.memory_space<vmem>>, %arg5: memref<1x256x128xf32, #tpu.memory_space<vmem>>) attributes {dimension_semantics = [#tpu.dimension_semantics<parallel>], iteration_bounds = array<i64: 2>, scalar_prefetch = 0 : i64, scratch_operands = 0 : i64, tpu.core_type = #tpu.core_type<tc>, window_params = [{transform_indices = @transform_0, window_bounds = array<i64: 1, 18, 16, 12>}, {pipeline_mode = #tpu.pipeline_mode<synchronous>, transform_indices = @transform_1, window_bounds = array<i64: 3, 12, 128>}, {pipeline_mode = #tpu.pipeline_mode<synchronous>, transform_indices = @transform_2, window_bounds = array<i64: 1, 128>}, {pipeline_mode = #tpu.pipeline_mode<synchronous>, transform_indices = @transform_3, window_bounds = array<i64: 128, 128>}, {transform_indices = @transform_4, window_bounds = array<i64: 1, 256, 128>}]} {
    %cst = arith.constant 0.000000e+00 : f32
    %0 = vector.broadcast %cst : f32 to vector<256x128xf32>
    %c0 = arith.constant 0 : index
    %c0_0 = arith.constant 0 : index
    %c0_1 = arith.constant 0 : index
    %c0_2 = arith.constant 0 : index
    %1 = vector.load %arg1[%c0, %c0_0, %c0_1, %c0_2] : memref<1x18x16x12xbf16, #tpu.memory_space<vmem>>, vector<1x16x16x12xbf16>
    %2 = vector.shape_cast %1 : vector<1x16x16x12xbf16> to vector<16x16x12xbf16>
    %3 = vector.shape_cast %2 : vector<16x16x12xbf16> to vector<256x12xbf16>
    %c0_3 = arith.constant 0 : index
    %c0_4 = arith.constant 0 : index
    %c0_5 = arith.constant 0 : index
    %4 = vector.load %arg2[%c0_3, %c0_4, %c0_5] : memref<3x12x128xbf16, #tpu.memory_space<vmem>>, vector<1x12x128xbf16>
    %5 = vector.shape_cast %4 : vector<1x12x128xbf16> to vector<12x128xbf16>
    %cst_6 = arith.constant dense<0.000000e+00> : vector<256x128xf32>
    %6 = tpu.matmul %3, %5, %cst_6 {dimension_numbers = #tpu.dot_dimension_numbers<[1], [0], [0], [1], [0, 0, 1, 1], [], []>} : vector<256x12xbf16>, vector<12x128xbf16>, vector<256x128xf32> -> vector<256x128xf32>
    %7 = arith.addf %0, %6 : vector<256x128xf32>
    %c0_7 = arith.constant 0 : index
    %c1 = arith.constant 1 : index
    %c0_8 = arith.constant 0 : index
    %c0_9 = arith.constant 0 : index
    %8 = vector.load %arg1[%c0_7, %c1, %c0_8, %c0_9] : memref<1x18x16x12xbf16, #tpu.memory_space<vmem>>, vector<1x16x16x12xbf16>
    %9 = vector.shape_cast %8 : vector<1x16x16x12xbf16> to vector<16x16x12xbf16>
    %10 = vector.shape_cast %9 : vector<16x16x12xbf16> to vector<256x12xbf16>
    %c1_10 = arith.constant 1 : index
    %c0_11 = arith.constant 0 : index
    %c0_12 = arith.constant 0 : index
    %11 = vector.load %arg2[%c1_10, %c0_11, %c0_12] : memref<3x12x128xbf16, #tpu.memory_space<vmem>>, vector<1x12x128xbf16>
    %12 = vector.shape_cast %11 : vector<1x12x128xbf16> to vector<12x128xbf16>
    %cst_13 = arith.constant dense<0.000000e+00> : vector<256x128xf32>
    %13 = tpu.matmul %10, %12, %cst_13 {dimension_numbers = #tpu.dot_dimension_numbers<[1], [0], [0], [1], [0, 0, 1, 1], [], []>} : vector<256x12xbf16>, vector<12x128xbf16>, vector<256x128xf32> -> vector<256x128xf32>
    %14 = arith.addf %7, %13 : vector<256x128xf32>
    %c0_14 = arith.constant 0 : index
    %c2 = arith.constant 2 : index
    %c0_15 = arith.constant 0 : index
    %c0_16 = arith.constant 0 : index
    %15 = vector.load %arg1[%c0_14, %c2, %c0_15, %c0_16] : memref<1x18x16x12xbf16, #tpu.memory_space<vmem>>, vector<1x16x16x12xbf16>
    %16 = vector.shape_cast %15 : vector<1x16x16x12xbf16> to vector<16x16x12xbf16>
    %17 = vector.shape_cast %16 : vector<16x16x12xbf16> to vector<256x12xbf16>
    %c2_17 = arith.constant 2 : index
    %c0_18 = arith.constant 0 : index
    %c0_19 = arith.constant 0 : index
    %18 = vector.load %arg2[%c2_17, %c0_18, %c0_19] : memref<3x12x128xbf16, #tpu.memory_space<vmem>>, vector<1x12x128xbf16>
    %19 = vector.shape_cast %18 : vector<1x12x128xbf16> to vector<12x128xbf16>
    %cst_20 = arith.constant dense<0.000000e+00> : vector<256x128xf32>
    %20 = tpu.matmul %17, %19, %cst_20 {dimension_numbers = #tpu.dot_dimension_numbers<[1], [0], [0], [1], [0, 0, 1, 1], [], []>} : vector<256x12xbf16>, vector<12x128xbf16>, vector<256x128xf32> -> vector<256x128xf32>
    %21 = arith.addf %14, %20 : vector<256x128xf32>
    %c0_21 = arith.constant 0 : index
    %c0_22 = arith.constant 0 : index
    %22 = vector.load %arg3[%c0_21, %c0_22] : memref<1x128xf32, #tpu.memory_space<vmem>>, vector<1x128xf32>
    %23 = vector.broadcast %22 : vector<1x128xf32> to vector<256x128xf32>
    %24 = arith.addf %21, %23 : vector<256x128xf32>
    %cst_23 = arith.constant 0.000000e+00 : f32
    %25 = vector.broadcast %cst_23 : f32 to vector<256x128xf32>
    %26 = arith.maximumf %24, %25 : vector<256x128xf32>
    %27 = arith.mulf %26, %26 : vector<256x128xf32>
    %28 = arith.truncf %27 : vector<256x128xf32> to vector<256x128xbf16>
    %c0_24 = arith.constant 0 : index
    %c0_25 = arith.constant 0 : index
    %29 = vector.load %arg4[%c0_24, %c0_25] : memref<128x128xbf16, #tpu.memory_space<vmem>>, vector<128x128xbf16>
    %cst_26 = arith.constant dense<0.000000e+00> : vector<256x128xf32>
    %30 = tpu.matmul %28, %29, %cst_26 {dimension_numbers = #tpu.dot_dimension_numbers<[1], [0], [0], [1], [0, 0, 1, 1], [], []>} : vector<256x128xbf16>, vector<128x128xbf16>, vector<256x128xf32> -> vector<256x128xf32>
    %cst_27 = arith.constant 2.000000e+00 : f32
    %31 = vector.broadcast %cst_27 : f32 to vector<256x128xf32>
    %32 = arith.addf %31, %30 : vector<256x128xf32>
    %33 = math.rsqrt %32 : vector<256x128xf32>
    %34 = math.sqrt %32 : vector<256x128xf32>
    %35 = math.rsqrt %34 : vector<256x128xf32>
    %36 = arith.mulf %33, %35 : vector<256x128xf32>
    %37 = arith.mulf %26, %36 : vector<256x128xf32>
    %c0_28 = arith.constant 0 : index
    %c0_29 = arith.constant 0 : index
    %c0_30 = arith.constant 0 : index
    %38 = vector.load %arg5[%c0_28, %c0_29, %c0_30] : memref<1x256x128xf32, #tpu.memory_space<vmem>>, vector<1x256x128xf32>
    %39 = vector.shape_cast %38 : vector<1x256x128xf32> to vector<256x128xf32>
    %40 = vector.shape_cast %37 : vector<256x128xf32> to vector<1x256x128xf32>
    tpu.vector_store %arg5[%c0_28, %c0_29, %c0_30], %40 {strides = array<i32>} : memref<1x256x128xf32, #tpu.memory_space<vmem>>, vector<1x256x128xf32>,
    return
  }
  func.func @transform_0(%arg0: i32) -> (i32, i32, i32, i32) {
    %c0_i32 = arith.constant 0 : i32
    %c0_i32_0 = arith.constant 0 : i32
    %c0_i32_1 = arith.constant 0 : i32
    %c0_i32_2 = arith.constant 0 : i32
    return %arg0, %c0_i32, %c0_i32_0, %c0_i32_1 : i32, i32, i32, i32
  }
  func.func @transform_1(%arg0: i32) -> (i32, i32, i32) {
    %c0_i32 = arith.constant 0 : i32
    %c0_i32_0 = arith.constant 0 : i32
    %c0_i32_1 = arith.constant 0 : i32
    %c0_i32_2 = arith.constant 0 : i32
    return %c0_i32, %c0_i32_0, %c0_i32_1 : i32, i32, i32
  }
  func.func @transform_2(%arg0: i32) -> (i32, i32) {
    %c0_i32 = arith.constant 0 : i32
    %c0_i32_0 = arith.constant 0 : i32
    %c0_i32_1 = arith.constant 0 : i32
    return %c0_i32, %c0_i32_0 : i32, i32
  }
  func.func @transform_3(%arg0: i32) -> (i32, i32) {
    %c0_i32 = arith.constant 0 : i32
    %c0_i32_0 = arith.constant 0 : i32
    %c0_i32_1 = arith.constant 0 : i32
    return %c0_i32, %c0_i32_0 : i32, i32
  }
  func.func @transform_4(%arg0: i32) -> (i32, i32, i32) {
    %c0_i32 = arith.constant 0 : i32
    %c0_i32_0 = arith.constant 0 : i32
    %c0_i32_1 = arith.constant 0 : i32
    return %arg0, %c0_i32, %c0_i32_0 : i32, i32, i32
  }
}

</mosaic_0001>

<bundles_post_ra>
// kernel: tpu_custom_call.1
= control target key start
LH: loop header
LB: loop body
LE: loop exit
PB: predicated region body
PF: predicated region fallthrough
CT: control target
= control target key end

     0   :  { %9 = vsyncpa [#allocation3], 0  ;;  %s3836_s0 = inlined_call_operand.vmem [shape: bf16[2,18,16,12], index: 0, kind: input, shape index: {}]   ;;  %s3837_s1 = inlined_call_operand.vmem [shape: bf16[3,12,128], index: 1, kind: input, shape index: {}]   ;;  %s3838_s2 = inlined_call_operand.vmem [shape: f32[1,128], index: 2, kind: input, shape index: {}]   ;;  %s3839_s3 = inlined_call_operand.vmem [shape: bf16[128,128], index: 3, kind: input, shape index: {}]   ;;  %s3840_s4 = inlined_call_operand.hbm [shape: f32[2,256,128], index: 4, kind: output, shape index: {}]  }
   0x1   :  { %11 = vsyncpa [#allocation3 + $0x1], 0  ;;  %s2833_s15 = smov 0   ;;  %s2835_s16 = smov 0  }
   0x2   :  { %s2837_s17 = smov 0   ;;  %s2839_s18 = smov 0  }
   0x3 LB: > { %s2854_s19 = sadd.s32 4294967295, %s2803_s18   ;;  %s2032_s20 = sadd.s32 4294967294, %s2803_s18   ;;  %s2803_s18 = sphi %s2839_s18, %s3846_s18   ;;  %s2799_s17 = sphi %s2837_s17, %s3845_s17   ;;  %s2795_s16 = sphi %s2835_s16, %s3844_s16   ;;  %s2791_s15 = sphi %s2833_s15, %s3843_s15  }
   0x4   : > { %s2858_s21 = sadd.s32 1, %s2803_s18   ;;  %s113_s22 = sadd.s32 1, %s2799_s17 }
   0x5   : > { %s110_s23 = ssub.s32 %s2803_s18, %s2858_s21  ;;  %p123_p0 = scmp.ne.s32.totalorder %s2799_s17, %s2795_s16 }
   0x6   : > { %p111_p1 = scmp.eq.s32.totalorder %s110_s23, 0  ;;  %p124_p2 = scmp.eq.s32.totalorder %s2854_s19, 1 }
   0x7   : > { %p129_p3 = scmp.ne.s32.totalorder %s2795_s16, %s2791_s15  ;;  %p130_p4 = scmp.eq.s32.totalorder %s2032_s20, 1 }
   0x8   : > { %s2869_s24 = scalar_select %p111_p1, %s2799_s17, %s113_s22  }
   0x9   : > { %p2871_p5 = por %p124_p2, %p123_p0  ;;  %p2875_p6 = por %p130_p4, %p129_p3 }
   0xa   : > { %p2035_p7 = scmp.ge.s32.totalorder %s2803_s18, 1  ;;  %p165_p8 = scmp.lt.s32.totalorder %s2803_s18, 3 }
   0xc   : > { %p166_p9 = pnand %p2035_p7, %p165_p8 }
   0xd   : > { %vm401_vm0 = vcmask (!%p166_p9), 1045504   ;;  %p191_p10 = scmp.lt.s32.totalorder (!%p166_p9), %s2854_s19, 1  ;;  %v2554_v0 = vld [vmem:[%s3837_s1] sm:$0x3f] (!%p166_p9)   ;;  %v2556_v1 = vld [vmem:[%s3837_s1 + $0x10] sm:$0x3f] (!%p166_p9)  }
   0xe   : > { %169 = sbr.rel (%p166_p9) target bundleno = 659 (0x293), region = 36  ;;  %2510 = vmatprep.subr.msk.bf16.mxu0 (!%p166_p9), %vm401_vm0, %v2554_v0  ;;  %v700_v2 = vsel (!%p166_p9), %vm401_vm0, %v2554_v0, 0  ;;  %v2572_v3 = vld [vmem:[%s3837_s1 + $0x8] sm:$0x3f] (!%p166_p9)   ;;  %v2605_v4 = vld [vmem:[%s3839_s3] sm:$0xff] (!%p166_p9)   ;;  %vm352_vm1 = vcmask (!%p166_p9), 97280  }
   0xf   : > { %2330 = vmatpush3.bf16.msra.mxu0 (!%p166_p9), %v700_v2  ;;  %2509 = vmatprep.subr.msk.bf16.mxu1 (!%p166_p9), %vm401_vm0, %v2572_v3  ;;  %v403_v5 = vsel (!%p166_p9), %vm401_vm0, %v2572_v3, 0  ;;  %v1033_v8 = vsel (!%p166_p9), %vm401_vm0, %v2556_v1, 0  ;;  %v2606_v14 = vld [vmem:[%s3839_s3 + $0x8] sm:$0xff] (!%p166_p9)   ;;  %v2607_v17 = vld [vmem:[%s3839_s3 + $0x10] sm:$0xff] (!%p166_p9)   ;;  %v2608_v35 = vld [vmem:[%s3839_s3 + $0x18] sm:$0xff] (!%p166_p9)   ;;  %s2219_s22 = sshll.u32 (!%p166_p9), %s2854_s19, 12 }
  0x10   : > { %2511 = vmatprep.subr.msk.bf16.mxu0 (!%p166_p9), %vm401_vm0, %v2556_v1  ;;  %2296 = vmatpush3.bf16.msra.mxu1 (!%p166_p9), %v403_v5  ;;  %v2609_v36 = vld [vmem:[%s3839_s3 + $0x20] sm:$0xff] (!%p166_p9)   ;;  %v2610_v37 = vld [vmem:[%s3839_s3 + $0x28] sm:$0xff] (!%p166_p9)   ;;  %v2611_v56 = vld [vmem:[%s3839_s3 + $0x30] sm:$0xff] (!%p166_p9)   ;;  %s2805_s5 = smov (!%p166_p9), [#allocation2]  }
  0x11   : > { %2397 = vmatprep.subr.bf16.mxu1 (!%p166_p9), %v2605_v4  ;;  %v2612_v61 = vld [vmem:[%s3839_s3 + $0x38] sm:$0xff] (!%p166_p9)  }
  0x15   : > { %s192_s29 = scalar_select %p191_p10, %s2854_s19, 1 }
  0x17   : > { %s2512_s6 = smul.u32 144, %s192_s29  ;;  %s3787_s29 = scalar_lea.hbm %s3840_s4, %s2219_s22 }
  0x19   : > { %s2901_s13 = scalar_lea.vmem %s3836_s0, %s2512_s6  ;;  %s2745_s6 = sshll.u32 %s2805_s5, 4  ;;  %s2746_s6 = int_to_ptr.vmem [resolvable:$false] %s2745_s6 }
  0x1a   : > { %v2555_v6 = vld [vmem:[%s2901_s13] sm:$0xff]   ;;  %v2557_v7 = vld [vmem:[%s2901_s13 + $0x8] sm:$0xff]   ;;  %v2558_v9 = vld [vmem:[%s2901_s13 + $0x10] sm:$0xff]   ;;  %s2747_s7 = scalar_lea.vmem %s2746_s6, 8192 }
  0x1b   : > { %2331 = vmatprep.mubr.msk.bf16.mxu0 %vm352_vm1, %v2555_v6  ;;  %v2559_v10 = vld [vmem:[%s2901_s13 + $0x18] sm:$0xff]   ;;  %v2560_v11 = vld [vmem:[%s2901_s13 + $0x20] sm:$0xff]   ;;  %v2561_v12 = vld [vmem:[%s2901_s13 + $0x28] sm:$0xff]  }
  0x1c   : > { %2332 = vmatmul.mubr.msk.bf16.vlgmr.msra.gmra.mrb[0].mxu0 %vm352_vm1, %v2557_v7  ;;  %v2562_v13 = vld [vmem:[%s2901_s13 + $0x30] sm:$0xff]   ;;  %v2573_v15 = vld [vmem:[%s2901_s13 + $0x8] sm:$0xff]   ;;  %v2577_v18 = vld [vmem:[%s2901_s13 + $0x18] sm:$0xff]  }
  0x1d   : > { %2364 = vmatpush3.bf16.msra.mxu0 %v1033_v8  ;;  %2335 = vmatprep.mubr.msk.bf16.mxu0 %vm352_vm1, %v2558_v9  ;;  %v2574_v16 = vld [vmem:[%s2901_s13 + $0x10] sm:$0xff]   ;;  %v2563_v19 = vld [vmem:[%s2901_s13 + $0x38] sm:$0xff]   ;;  %v2564_v20 = vld [vmem:[%s2901_s13 + $0x40] sm:$0xff]  }
  0x1e   : > { %2297 = vmatprep.mubr.msk.bf16.mxu1 %vm352_vm1, %v2573_v15  ;;  %v2578_v21 = vld [vmem:[%s2901_s13 + $0x20] sm:$0xff]   ;;  %v2581_v22 = vld [vmem:[%s2901_s13 + $0x28] sm:$0xff]   ;;  %v2566_v24 = vld [vmem:[%s2901_s13 + $0x50] sm:$0xff]  }
  0x1f   : > { %2298 = vmatmul.mubr.msk.bf16.vlgmr.msra.gmra.mrb[0].mxu1 %vm352_vm1, %v2574_v16  ;;  %v2565_v23 = vld [vmem:[%s2901_s13 + $0x48] sm:$0xff]   ;;  %v2582_v25 = vld [vmem:[%s2901_s13 + $0x30] sm:$0xff]   ;;  %v2585_v26 = vld [vmem:[%s2901_s13 + $0x38] sm:$0xff]  }
  0x20   : > { %2398 = vmatpush3.bf16.msra.mxu1 %v2605_v4  ;;  %2301 = vmatprep.mubr.msk.bf16.mxu1 %vm352_vm1, %v2577_v18  ;;  %v2567_v27 = vld [vmem:[%s2901_s13 + $0x58] sm:$0xff]   ;;  %v2568_v28 = vld [vmem:[%s2901_s13 + $0x60] sm:$0xff]   ;;  %v2589_v30 = vld [vmem:[%s2901_s13 + $0x48] sm:$0xff]  }
  0x21   : > { %2399 = vmatprep.subr.bf16.mxu1 %v2606_v14  ;;  %v2586_v29 = vld [vmem:[%s2901_s13 + $0x40] sm:$0xff]   ;;  %v2569_v31 = vld [vmem:[%s2901_s13 + $0x68] sm:$0xff]   ;;  %v2570_v32 = vld [vmem:[%s2901_s13 + $0x70] sm:$0xff]  }
  0x22   : > { %v2590_v33 = vld [vmem:[%s2901_s13 + $0x50] sm:$0xff]   ;;  %v2593_v34 = vld [vmem:[%s2901_s13 + $0x58] sm:$0xff]   ;;  %v2594_v39 = vld [vmem:[%s2901_s13 + $0x60] sm:$0xff]  }
  0x23   : > { %v2571_v38 = vld [vmem:[%s2901_s13 + $0x78] sm:$0xff]   ;;  %v2575_v40 = vld [vmem:[%s2901_s13 + $0x10] sm:$0xff]   ;;  %v2597_v41 = vld [vmem:[%s2901_s13 + $0x68] sm:$0xff]  }
  0x24   : > { %2336 = vmatmul.mubr.msk.bf16.gmra.mrb[4].mxu0 %vm352_vm1, %v2559_v10  ;;  %2400 = vmatpush3.bf16.msra.mxu1 %v2606_v14  ;;  %v2576_v42 = vld [vmem:[%s2901_s13 + $0x18] sm:$0xff]   ;;  %v2598_v43 = vld [vmem:[%s2901_s13 + $0x70] sm:$0xff]   ;;  %v2579_v44 = vld [vmem:[%s2901_s13 + $0x20] sm:$0xff]  }
  0x25   : > { %2339 = vmatprep.mubr.msk.bf16.mxu0 %vm352_vm1, %v2560_v11  ;;  %2401 = vmatprep.subr.bf16.mxu1 %v2607_v17  ;;  %v2601_v45 = vld [vmem:[%s2901_s13 + $0x78] sm:$0xff]   ;;  %v2580_v46 = vld [vmem:[%s2901_s13 + $0x28] sm:$0xff]   ;;  %v2602_v47 = vld [vmem:[%s2901_s13 + $0x80] sm:$0xff]  }
  0x26   : > { %v2583_v48 = vld [vmem:[%s2901_s13 + $0x30] sm:$0xff]   ;;  %v2584_v49 = vld [vmem:[%s2901_s13 + $0x38] sm:$0xff]   ;;  %v2587_v50 = vld [vmem:[%s2901_s13 + $0x40] sm:$0xff]  }
  0x27   : > { %2302 = vmatmul.mubr.msk.bf16.gmra.mrb[4].mxu1 %vm352_vm1, %v2578_v21  ;;  %v2588_v51 = vld [vmem:[%s2901_s13 + $0x48] sm:$0xff]   ;;  %v2591_v52 = vld [vmem:[%s2901_s13 + $0x50] sm:$0xff]   ;;  %v2592_v53 = vld [vmem:[%s2901_s13 + $0x58] sm:$0xff]  }
  0x28   : > { %2305 = vmatprep.mubr.msk.bf16.mxu1 %vm352_vm1, %v2581_v22  ;;  %2402 = vmatpush3.bf16.msra.mxu1 %v2607_v17  ;;  %v2595_v54 = vld [vmem:[%s2901_s13 + $0x60] sm:$0xff]   ;;  %v2596_v55 = vld [vmem:[%s2901_s13 + $0x68] sm:$0xff]   ;;  %v2599_v57 = vld [vmem:[%s2901_s13 + $0x70] sm:$0xff]  }
  0x29   : > { %2403 = vmatprep.subr.bf16.mxu1 %v2608_v35  ;;  %v2600_v58 = vld [vmem:[%s2901_s13 + $0x78] sm:$0xff]   ;;  %v2603_v59 = vld [vmem:[%s2901_s13 + $0x80] sm:$0xff]   ;;  %v2604_v60 = vld [vmem:[%s2901_s13 + $0x88] sm:$0xff]   ;;  %s188_s13 = sand.u32 1, %s2795_s16  }
  0x2a   : > { %s3354_s14 = sshll.u32 %s188_s13, 8  ;;  %s3795_s30 = scalar_lea.sflag [#allocation3], %s188_s13 }
  0x2b   : > { %s3392_s20 = scalar_lea.vmem [#allocation2], %s3354_s14 }
  0x2c   : > { %2340 = vmatmul.mubr.msk.bf16.gmra.mrb[8].mxu0 %vm352_vm1, %v2561_v12  ;;  %2404 = vmatpush3.bf16.msra.mxu1 %v2608_v35  ;;  %s1970_s23 = sshll.u32 %s3392_s20, 4  ;;  %s3789_s23 = int_to_ptr.vmem [resolvable:$true] %s1970_s23 }
  0x2d   : > { %2343 = vmatprep.mubr.msk.bf16.mxu0 %vm352_vm1, %v2562_v13  ;;  %2405 = vmatprep.subr.bf16.mxu1 %v2609_v36  ;;  %s2741_s19 = scalar_lea.vmem %s3789_s23, 4096  ;;  %p2748_p0 = scmp.lt.s32.totalorder %s3789_s23, %s2746_s6 }
  0x2e   : > { %p2742_p11 = scmp.ne.s32.totalorder %s3789_s23, %s2741_s19  ;;  %p2749_p1 = scmp.lt.s32.totalorder %s2747_s7, %s2741_s19 }
  0x2f   : > { %2306 = vmatmul.mubr.msk.bf16.gmra.mrb[8].mxu1 %vm352_vm1, %v2582_v25 }
  0x30   : > { %2309 = vmatprep.mubr.msk.bf16.mxu1 %vm352_vm1, %v2585_v26  ;;  %2406 = vmatpush3.bf16.msra.mxu1 %v2609_v36  ;;  %p2743_p12 = pnand %p2742_p11, %p2871_p5  ;;  %p2750_p2 = por %p2749_p1, %p2748_p0 }
  0x31   : > { %2407 = vmatprep.subr.bf16.mxu1 %v2610_v37 }
  0x32   : > { %p2744_p13 = pneg %p2743_p12 }
  0x34   : > { %2344 = vmatmul.mubr.msk.bf16.gmra.mrb[12].mxu0 %vm352_vm1, %v2563_v19  ;;  %2408 = vmatpush3.bf16.msra.mxu1 %v2610_v37  ;;  %p2751_p3 = pnand %p2750_p2, %p2744_p13 }
  0x35   : > { %2347 = vmatprep.mubr.msk.bf16.mxu0 %vm352_vm1, %v2564_v20  ;;  %2409 = vmatprep.subr.bf16.mxu1 %v2611_v56 }
  0x37   : > { %2310 = vmatmul.mubr.msk.bf16.gmra.mrb[12].mxu1 %vm352_vm1, %v2586_v29 }
  0x38   : > { %2313 = vmatprep.mubr.msk.bf16.mxu1 %vm352_vm1, %v2589_v30  ;;  %2410 = vmatpush3.bf16.msra.mxu1 %v2611_v56 }
  0x39   : > { %2411 = vmatprep.subr.bf16.mxu1 %v2612_v61 }
  0x3c   : > { %2348 = vmatmul.mubr.msk.bf16.gmra.mrb[16].mxu0 %vm352_vm1, %v2565_v23  ;;  %2412 = vmatpush3.bf16.msra.mxu1 %v2612_v61  ;;  %v3058_v23 = vld [vmem:[%s3838_s2] ss:$0 sm:$0xff] }
  0x3d   : > { %2351 = vmatprep.mubr.msk.bf16.mxu0 %vm352_vm1, %v2566_v24 }
  0x3f   : > { %2314 = vmatmul.mubr.msk.bf16.gmra.mrb[16].mxu1 %vm352_vm1, %v2590_v33 }
  0x40   : > { %2317 = vmatprep.mubr.msk.bf16.mxu1 %vm352_vm1, %v2593_v34 }
  0x44   : > { %2352 = vmatmul.mubr.msk.bf16.gmra.mrb[20].mxu0 %vm352_vm1, %v2567_v27 }
  0x45   : > { %2355 = vmatprep.mubr.msk.bf16.mxu0 %vm352_vm1, %v2568_v28 }
  0x47   : > { %2318 = vmatmul.mubr.msk.bf16.gmra.mrb[20].mxu1 %vm352_vm1, %v2594_v39 }
  0x48   : > { %2321 = vmatprep.mubr.msk.bf16.mxu1 %vm352_vm1, %v2597_v41 }
  0x4c   : > { %2356 = vmatmul.mubr.msk.bf16.gmra.mrb[24].mxu0 %vm352_vm1, %v2569_v31 }
  0x4d   : > { %2359 = vmatprep.mubr.msk.bf16.mxu0 %vm352_vm1, %v2570_v32 }
  0x4f   : > { %2322 = vmatmul.mubr.msk.bf16.gmra.mrb[24].mxu1 %vm352_vm1, %v2598_v43 }
  0x50   : > { %2325 = vmatprep.mubr.msk.bf16.mxu1 %vm352_vm1, %v2601_v45 }
  0x54   : > { %2360 = vmatmul.mubr.msk.bf16.gmra.mrb[28].mxu0 %vm352_vm1, %v2571_v38 }
  0x55   : > { %2365 = vmatprep.mubr.msk.bf16.mxu0 %vm352_vm1, %v2575_v40 }
  0x57   : > { %2326 = vmatmul.mubr.msk.bf16.gmra.mrb[28].mxu1 %vm352_vm1, %v2602_v47 }
  0x5c   : > { %2366 = vmatmul.mubr.msk.bf16.vlgmr.msra.gmra.mrb[0].mxu0 %vm352_vm1, %v2576_v42 }
  0x5d   : > { %2369 = vmatprep.mubr.msk.bf16.mxu0 %vm352_vm1, %v2579_v44 }
  0x64   : > { %2370 = vmatmul.mubr.msk.bf16.gmra.mrb[4].mxu0 %vm352_vm1, %v2580_v46 }
  0x65   : > { %2373 = vmatprep.mubr.msk.bf16.mxu0 %vm352_vm1, %v2583_v48 }
  0x6c   : > { %2374 = vmatmul.mubr.msk.bf16.gmra.mrb[8].mxu0 %vm352_vm1, %v2584_v49 }
  0x6d   : > { %2377 = vmatprep.mubr.msk.bf16.mxu0 %vm352_vm1, %v2587_v50 }
  0x74   : > { %2378 = vmatmul.mubr.msk.bf16.gmra.mrb[12].mxu0 %vm352_vm1, %v2588_v51 }
  0x75   : > { %2381 = vmatprep.mubr.msk.bf16.mxu0 %vm352_vm1, %v2591_v52 }
  0x7c   : > { %2382 = vmatmul.mubr.msk.bf16.gmra.mrb[16].mxu0 %vm352_vm1, %v2592_v53 }
  0x7d   : > { %2385 = vmatprep.mubr.msk.bf16.mxu0 %vm352_vm1, %v2595_v54 }
  0x84   : > { %2386 = vmatmul.mubr.msk.bf16.gmra.mrb[20].mxu0 %vm352_vm1, %v2596_v55 }
  0x85   : > { %2389 = vmatprep.mubr.msk.bf16.mxu0 %vm352_vm1, %v2599_v57 }
  0x8c   : > { %2390 = vmatmul.mubr.msk.bf16.gmra.mrb[24].mxu0 %vm352_vm1, %v2600_v58 }
  0x8d   : > { %2393 = vmatprep.mubr.msk.bf16.mxu0 %vm352_vm1, %v2603_v59 }
  0x94   : > { %2394 = vmatmul.mubr.msk.bf16.gmra.mrb[28].mxu0 %vm352_vm1, %v2604_v60 }
  0xf2   : > { %v2299_v62 = vpop.f32.mrb[0].mxu1 }
  0xf3   : > { %v439_v63 = vpop.f32.mrb[1].mxu1 }
  0xf4   : > { %v2300_v0 = vpop.f32.mrb[2].mxu1 }
  0xf5   : > { %v442_v1 = vpop.f32.mrb[3].mxu1 }
  0xfa   : > { %v2303_v2 = vpop.f32.mrb[4].mxu1 }
  0xfb   : > { %v455_v3 = vpop.f32.mrb[5].mxu1 }
  0xfc   : > { %v2304_v4 = vpop.f32.mrb[6].mxu1 }
  0xfd   : > { %v458_v5 = vpop.f32.mrb[7].mxu1 }
 0x102   : > { %v3023_v6 = vpop.f32.mrb[8].mxu1 }
 0x103   : > { %v3025_v7 = vpop.f32.mrb[9].mxu1 }
 0x104   : > { %v3027_v8 = vpop.f32.mrb[10].mxu1 }
 0x105   : > { %v3029_v9 = vpop.f32.mrb[11].mxu1 }
 0x10a   : > { %v3031_v10 = vpop.f32.mrb[12].mxu1 }
 0x10b   : > { %v3033_v11 = vpop.f32.mrb[13].mxu1 }
 0x10c   : > { %v3035_v12 = vpop.f32.mrb[14].mxu1 }
 0x10d   : > { %v3037_v13 = vpop.f32.mrb[15].mxu1 }
 0x112   : > { %v3039_v14 = vpop.f32.mrb[16].mxu1 }
 0x113   : > { %v3041_v15 = vpop.f32.mrb[17].mxu1 }
 0x114   : > { %v3043_v16 = vpop.f32.mrb[18].mxu1 }
 0x115   : > { %v3045_v17 = vpop.f32.mrb[19].mxu1 }
 0x11a   : > { %v3047_v18 = vpop.f32.mrb[20].mxu1 }
 0x11b   : > { %v3049_v19 = vpop.f32.mrb[21].mxu1 }
 0x11c   : > { %v3051_v20 = vpop.f32.mrb[22].mxu1 }
 0x11d   : > { %v3053_v21 = vpop.f32.mrb[23].mxu1 }
 0x122   : > { %v3060_v24 = vpop.f32.mrb[24].mxu1 }
 0x123   : > { %v3062_v27 = vpop.f32.mrb[25].mxu1 }
 0x124   : > { %v3064_v30 = vpop.f32.mrb[26].mxu1 }
 0x125   : > { %v3067_v34 = vpop.f32.mrb[27].mxu1 }
 0x12a   : > { %v3080_v44 = vpop.f32.mrb[28].mxu1 }
 0x12b   : > { %v3084_v48 = vpop.f32.mrb[29].mxu1 }
 0x12c   : > { %v3090_v53 = vpop.f32.mrb[30].mxu1 }
 0x12d   : > { %v3095_v58 = vpop.f32.mrb[31].mxu1 }
 0x12f   : > { %v2367_v22 = vpop.f32.mrb[0].mxu0 }
 0x130   : > { %v2445_v25 = vadd.f32 %v2367_v22, %v2299_v62  ;;  %v1069_v26 = vpop.f32.mrb[1].mxu0 }
 0x131   : > { %v2446_v28 = vadd.f32 %v1069_v26, %v439_v63  ;;  %v2368_v29 = vpop.f32.mrb[2].mxu0 }
 0x132   : > { %v1237_v31 = vadd.f32 %v2445_v25, %v3058_v23  ;;  %v2447_v32 = vadd.f32 %v2368_v29, %v2300_v0  ;;  %v1072_v33 = vpop.f32.mrb[3].mxu0 }
 0x133   : > { %v1235_v35 = vadd.f32 %v2446_v28, %v3058_v23  ;;  %v2448_v36 = vadd.f32 %v1072_v33, %v442_v1 }
 0x134   : > { %v1238_v37 = vadd.f32 %v2447_v32, %v3058_v23  ;;  %v3074_v40 = vmax.f32 %v1237_v31, 0.0 }
 0x135   : > { %v3071_v38 = vmax.f32 %v1235_v35, 0.0  ;;  %v1236_v39 = vadd.f32 %v2448_v36, %v3058_v23 }
 0x136   : > { %v3076_v41 = vmax.f32 %v1238_v37, 0.0  ;;  %v1301_v54 = vmul.f32 %v3074_v40, %v3074_v40 }
 0x137   : > { %v3078_v42 = vmax.f32 %v1236_v39, 0.0  ;;  %v2371_v43 = vpop.f32.mrb[4].mxu0  ;;  %v1299_v49 = vmul.f32 %v3071_v38, %v3071_v38 }
 0x138   : > { %v1302_v45 = vmul.f32 %v3076_v41, %v3076_v41  ;;  %v2449_v46 = vadd.f32 %v2371_v43, %v2303_v2  ;;  %v1085_v47 = vpop.f32.mrb[5].mxu0 }
 0x139   : > { %v1300_v50 = vmul.f32 %v3078_v42, %v3078_v42  ;;  %v2450_v51 = vadd.f32 %v1085_v47, %v455_v3  ;;  %v2372_v52 = vpop.f32.mrb[6].mxu0 }
 0x13a   : > { %v1241_v55 = vadd.f32 %v2449_v46, %v3058_v23  ;;  %v2451_v56 = vadd.f32 %v2372_v52, %v2304_v4  ;;  %v1088_v57 = vpop.f32.mrb[7].mxu0  ;;  %v1332_v62 = vpack.c.bf16 %v1302_v45, %v1301_v54 }
 0x13b   : > { %v1239_v59 = vadd.f32 %v2450_v51, %v3058_v23  ;;  %v2452_v60 = vadd.f32 %v1088_v57, %v458_v5  ;;  %v1331_v61 = vpack.c.bf16 %v1300_v50, %v1299_v49 }
 0x13c   : > { %v1242_v63 = vadd.f32 %v2451_v56, %v3058_v23  ;;  %v3102_v2 = vmax.f32 %v1241_v55, 0.0 }
 0x13d   : > { %v3099_v0 = vmax.f32 %v1239_v59, 0.0  ;;  %v1240_v1 = vadd.f32 %v2452_v60, %v3058_v23  ;;  %2413 = vmatprep.mubr.bf16.mxu1 %v1331_v61 }
 0x13e   : > { %v3104_v3 = vmax.f32 %v1242_v63, 0.0  ;;  %2414 = vmatmul.mubr.bf16.vlgmr.msra.gmra.mrb[32].mxu1 %v1332_v62  ;;  %v1305_v33 = vmul.f32 %v3102_v2, %v3102_v2 }
 0x13f   : > { %v3106_v4 = vmax.f32 %v1240_v1, 0.0  ;;  %v2375_v22 = vpop.f32.mrb[8].mxu0  ;;  %v1303_v28 = vmul.f32 %v3099_v0, %v3099_v0 }
 0x140   : > { %v1306_v5 = vmul.f32 %v3104_v3, %v3104_v3  ;;  %v2453_v25 = vadd.f32 %v2375_v22, %v3023_v6  ;;  %v1101_v26 = vpop.f32.mrb[9].mxu0 }
 0x141   : > { %v1304_v29 = vmul.f32 %v3106_v4, %v3106_v4  ;;  %v2454_v31 = vadd.f32 %v1101_v26, %v3025_v7  ;;  %v2376_v32 = vpop.f32.mrb[10].mxu0 }
 0x142   : > { %v1245_v35 = vadd.f32 %v2453_v25, %v3058_v23  ;;  %v2455_v36 = vadd.f32 %v2376_v32, %v3027_v8  ;;  %v1104_v37 = vpop.f32.mrb[11].mxu0  ;;  %v1334_v46 = vpack.c.bf16 %v1306_v5, %v1305_v33 }
 0x143   : > { %v1243_v6 = vadd.f32 %v2454_v31, %v3058_v23  ;;  %v2456_v39 = vadd.f32 %v1104_v37, %v3029_v9  ;;  %v1333_v43 = vpack.c.bf16 %v1304_v29, %v1303_v28 }
 0x144   : > { %v1246_v45 = vadd.f32 %v2455_v36, %v3058_v23  ;;  %v3126_v49 = vmax.f32 %v1245_v35, 0.0 }
 0x145   : > { %v3123_v47 = vmax.f32 %v1243_v6, 0.0  ;;  %v1244_v7 = vadd.f32 %v2456_v39, %v3058_v23  ;;  %2417 = vmatprep.mubr.bf16.mxu1 %v1333_v43 }
 0x146   : > { %v3128_v50 = vmax.f32 %v1246_v45, 0.0  ;;  %2418 = vmatmul.mubr.bf16.gmra.mrb[36].mxu1 %v1334_v46  ;;  %v1309_v60 = vmul.f32 %v3126_v49, %v3126_v49 }
 0x147   : > { %v3130_v8 = vmax.f32 %v1244_v7, 0.0  ;;  %v2379_v51 = vpop.f32.mrb[12].mxu0  ;;  %v1307_v55 = vmul.f32 %v3123_v47, %v3123_v47 }
 0x148   : > { %v1310_v9 = vmul.f32 %v3128_v50, %v3128_v50  ;;  %v2457_v52 = vadd.f32 %v2379_v51, %v3031_v10  ;;  %v1117_v54 = vpop.f32.mrb[13].mxu0 }
 0x149   : > { %v1308_v56 = vmul.f32 %v3130_v8, %v3130_v8  ;;  %v2458_v57 = vadd.f32 %v1117_v54, %v3033_v11  ;;  %v2380_v59 = vpop.f32.mrb[14].mxu0 }
 0x14a   : > { %v1249_v61 = vadd.f32 %v2457_v52, %v3058_v23  ;;  %v2459_v62 = vadd.f32 %v2380_v59, %v3035_v12  ;;  %v1120_v63 = vpop.f32.mrb[15].mxu0  ;;  %v1336_v25 = vpack.c.bf16 %v1310_v9, %v1309_v60 }
 0x14b   : > { %v1247_v10 = vadd.f32 %v2458_v57, %v3058_v23  ;;  %v2460_v1 = vadd.f32 %v1120_v63, %v3037_v13  ;;  %v1335_v22 = vpack.c.bf16 %v1308_v56, %v1307_v55 }
 0x14c   : > { %v1250_v5 = vadd.f32 %v2459_v62, %v3058_v23  ;;  %v3150_v28 = vmax.f32 %v1249_v61, 0.0 }
 0x14d   : > { %v3147_v26 = vmax.f32 %v1247_v10, 0.0  ;;  %v1248_v11 = vadd.f32 %v2460_v1, %v3058_v23  ;;  %2421 = vmatprep.mubr.bf16.mxu1 %v1335_v22 }
 0x14e   : > { %v3152_v29 = vmax.f32 %v1250_v5, 0.0  ;;  %2422 = vmatmul.mubr.bf16.gmra.mrb[40].mxu1 %v1336_v25  ;;  %v1313_v39 = vmul.f32 %v3150_v28, %v3150_v28 }
 0x14f   : > { %v3154_v12 = vmax.f32 %v1248_v11, 0.0  ;;  %v2383_v31 = vpop.f32.mrb[16].mxu0  ;;  %v1311_v35 = vmul.f32 %v3147_v26, %v3147_v26 }
 0x150   : > { %v1314_v13 = vmul.f32 %v3152_v29, %v3152_v29  ;;  %v2461_v32 = vadd.f32 %v2383_v31, %v3039_v14  ;;  %v1133_v33 = vpop.f32.mrb[17].mxu0 }
 0x151   : > { %v1312_v36 = vmul.f32 %v3154_v12, %v3154_v12  ;;  %v2462_v37 = vadd.f32 %v1133_v33, %v3041_v15  ;;  %v2384_v6 = vpop.f32.mrb[18].mxu0 }
 0x152   : > { %v1253_v43 = vadd.f32 %v2461_v32, %v3058_v23  ;;  %v2463_v45 = vadd.f32 %v2384_v6, %v3043_v16  ;;  %v1136_v46 = vpop.f32.mrb[19].mxu0  ;;  %v1338_v52 = vpack.c.bf16 %v1314_v13, %v1313_v39 }
 0x153   : > { %v1251_v14 = vadd.f32 %v2462_v37, %v3058_v23  ;;  %v2464_v7 = vadd.f32 %v1136_v46, %v3045_v17  ;;  %v1337_v51 = vpack.c.bf16 %v1312_v36, %v1311_v35 }
 0x154   : > { %v1254_v9 = vadd.f32 %v2463_v45, %v3058_v23  ;;  %v3174_v55 = vmax.f32 %v1253_v43, 0.0 }
 0x155   : > { %v3171_v54 = vmax.f32 %v1251_v14, 0.0  ;;  %v1252_v15 = vadd.f32 %v2464_v7, %v3058_v23  ;;  %2425 = vmatprep.mubr.bf16.mxu1 %v1337_v51 }
 0x156   : > { %v3176_v56 = vmax.f32 %v1254_v9, 0.0  ;;  %2426 = vmatmul.mubr.bf16.gmra.mrb[44].mxu1 %v1338_v52  ;;  %v1317_v1 = vmul.f32 %v3174_v55, %v3174_v55 }
 0x157   : > { %v3178_v16 = vmax.f32 %v1252_v15, 0.0  ;;  %v2387_v57 = vpop.f32.mrb[20].mxu0  ;;  %v1315_v61 = vmul.f32 %v3171_v54, %v3171_v54 }
 0x158   : > { %v1318_v17 = vmul.f32 %v3176_v56, %v3176_v56  ;;  %v2465_v59 = vadd.f32 %v2387_v57, %v3047_v18  ;;  %v1149_v60 = vpop.f32.mrb[21].mxu0 }
 0x159   : > { %v1316_v62 = vmul.f32 %v3178_v16, %v3178_v16  ;;  %v2466_v63 = vadd.f32 %v1149_v60, %v3049_v19  ;;  %v2388_v10 = vpop.f32.mrb[22].mxu0 }
 0x15a   : > { %v1257_v22 = vadd.f32 %v2465_v59, %v3058_v23  ;;  %v2467_v5 = vadd.f32 %v2388_v10, %v3051_v20  ;;  %v1152_v25 = vpop.f32.mrb[23].mxu0  ;;  %v1340_v32 = vpack.c.bf16 %v1318_v17, %v1317_v1 }
 0x15b   : > { %v1255_v18 = vadd.f32 %v2466_v63, %v3058_v23  ;;  %v2468_v11 = vadd.f32 %v1152_v25, %v3053_v21  ;;  %v1339_v31 = vpack.c.bf16 %v1316_v62, %v1315_v61 }
 0x15c   : > { %v1258_v13 = vadd.f32 %v2467_v5, %v3058_v23  ;;  %v3198_v35 = vmax.f32 %v1257_v22, 0.0 }
 0x15d   : > { %v3195_v33 = vmax.f32 %v1255_v18, 0.0  ;;  %v1256_v19 = vadd.f32 %v2468_v11, %v3058_v23  ;;  %2429 = vmatprep.mubr.bf16.mxu1 %v1339_v31 }
 0x15e   : > { %v3200_v36 = vmax.f32 %v1258_v13, 0.0  ;;  %2430 = vmatmul.mubr.bf16.gmra.mrb[48].mxu1 %v1340_v32  ;;  %v1321_v7 = vmul.f32 %v3198_v35, %v3198_v35 }
 0x15f   : > { %v3202_v20 = vmax.f32 %v1256_v19, 0.0  ;;  %v2391_v37 = vpop.f32.mrb[24].mxu0  ;;  %v1319_v43 = vmul.f32 %v3195_v33, %v3195_v33 }
 0x160   : > { %v1322_v21 = vmul.f32 %v3200_v36, %v3200_v36  ;;  %v2469_v6 = vadd.f32 %v2391_v37, %v3060_v24  ;;  %v1165_v39 = vpop.f32.mrb[25].mxu0 }
 0x161   : > { %v1320_v45 = vmul.f32 %v3202_v20, %v3202_v20  ;;  %v2470_v46 = vadd.f32 %v1165_v39, %v3062_v27  ;;  %v2392_v14 = vpop.f32.mrb[26].mxu0 }
 0x162   : > { %v1261_v51 = vadd.f32 %v2469_v6, %v3058_v23  ;;  %v2471_v9 = vadd.f32 %v2392_v14, %v3064_v30  ;;  %v1168_v52 = vpop.f32.mrb[27].mxu0  ;;  %v1342_v59 = vpack.c.bf16 %v1322_v21, %v1321_v7 }
 0x163   : > { %v1259_v24 = vadd.f32 %v2470_v46, %v3058_v23  ;;  %v2472_v15 = vadd.f32 %v1168_v52, %v3067_v34  ;;  %v1341_v57 = vpack.c.bf16 %v1320_v45, %v1319_v43 }
 0x164   : > { %v1262_v17 = vadd.f32 %v2471_v9, %v3058_v23  ;;  %v3222_v61 = vmax.f32 %v1261_v51, 0.0 }
 0x165   : > { %v3219_v60 = vmax.f32 %v1259_v24, 0.0  ;;  %v1260_v27 = vadd.f32 %v2472_v15, %v3058_v23  ;;  %2433 = vmatprep.mubr.bf16.mxu1 %v1341_v57 }
 0x166   : > { %v3224_v62 = vmax.f32 %v1262_v17, 0.0  ;;  %2434 = vmatmul.mubr.bf16.gmra.mrb[52].mxu1 %v1342_v59  ;;  %v1325_v11 = vmul.f32 %v3222_v61, %v3222_v61 }
 0x167   : > { %v3226_v30 = vmax.f32 %v1260_v27, 0.0  ;;  %v2395_v63 = vpop.f32.mrb[28].mxu0  ;;  %v1323_v22 = vmul.f32 %v3219_v60, %v3219_v60 }
 0x168   : > { %v1326_v34 = vmul.f32 %v3224_v62, %v3224_v62  ;;  %v2473_v10 = vadd.f32 %v2395_v63, %v3080_v44  ;;  %v1181_v1 = vpop.f32.mrb[29].mxu0 }
 0x169   : > { %v1324_v5 = vmul.f32 %v3226_v30, %v3226_v30  ;;  %v2474_v25 = vadd.f32 %v1181_v1, %v3084_v48  ;;  %v2396_v18 = vpop.f32.mrb[30].mxu0 }
 0x16a   : > { %v1265_v31 = vadd.f32 %v2473_v10, %v3058_v23  ;;  %v2475_v13 = vadd.f32 %v2396_v18, %v3090_v53  ;;  %v1184_v32 = vpop.f32.mrb[31].mxu0  ;;  %v1344_v6 = vpack.c.bf16 %v1326_v34, %v1325_v11 }
 0x16b   : > { %v1263_v44 = vadd.f32 %v2474_v25, %v3058_v23  ;;  %v2476_v19 = vadd.f32 %v1184_v32, %v3095_v58  ;;  %v1343_v37 = vpack.c.bf16 %v1324_v5, %v1323_v22 }
 0x16c   : > { %v1266_v21 = vadd.f32 %v2475_v13, %v3058_v23  ;;  %v3246_v43 = vmax.f32 %v1265_v31, 0.0 }
 0x16d   : > { %v3243_v39 = vmax.f32 %v1263_v44, 0.0  ;;  %v1264_v48 = vadd.f32 %v2476_v19, %v3058_v23  ;;  %2437 = vmatprep.mubr.bf16.mxu1 %v1343_v37 }
 0x16e   : > { %v3248_v45 = vmax.f32 %v1266_v21, 0.0  ;;  %2438 = vmatmul.mubr.bf16.gmra.mrb[56].mxu1 %v1344_v6  ;;  %v1329_v23 = vmul.f32 %v3246_v43, %v3246_v43 }
 0x16f   : > { %v3250_v53 = vmax.f32 %v1264_v48, 0.0  ;;  %v1327_v58 = vmul.f32 %v3243_v39, %v3243_v39 }
 0x170   : > { %v1330_v46 = vmul.f32 %v3248_v45, %v3248_v45 }
 0x171   : > { %v1328_v14 = vmul.f32 %v3250_v53, %v3250_v53 }
 0x172   : > { %v1346_v51 = vpack.c.bf16 %v1330_v46, %v1329_v23 }
 0x173   : > { %v1345_v7 = vpack.c.bf16 %v1328_v14, %v1327_v58 }
 0x175   : > { %2441 = vmatprep.mubr.bf16.mxu1 %v1345_v7 }
 0x176   : > { %2442 = vmatmul.mubr.bf16.gmra.mrb[60].mxu1 %v1346_v51 }
 0x211   : > { %v2415_v9 = vpop.f32.mrb[32].mxu1 }
 0x212   : > { %v1454_v52 = vadd.f32 2.0, %v2415_v9  ;;  %v1445_v24 = vpop.f32.mrb[33].mxu1 }
 0x213   : > { %v1446_v15 = vadd.f32 2.0, %v1445_v24  ;;  %v2416_v57 = vpop.f32.mrb[34].mxu1 }
 0x214   : > { %2613 = vrsqrt.f32 %v1454_v52  ;;  %v1448_v17 = vpop.f32.mrb[35].mxu1  ;;  %v1457_v59 = vadd.f32 2.0, %v2416_v57  ;;  %vm1620_vm2 = vcmp.eq.f32.partialorder %v1454_v52, inf  ;;  %vm1622_vm3 = vcmp.eq.f32.partialorder %v1454_v52, 0.0 }
 0x215   : > { %2615 = vrsqrt.f32 %v1446_v15  ;;  %v3260_v27 = vadd.f32 2.0, %v1448_v17  ;;  %v1623_v25 = vand.u32 2147483648, %v1454_v52  ;;  %vm1606_vm4 = vcmp.eq.f32.partialorder %v1446_v15, inf }
 0x216   : > { %2617 = vrsqrt.f32 %v1457_v59  ;;  %vm1608_vm5 = vcmp.eq.f32.partialorder %v1446_v15, 0.0  ;;  %v1609_v11 = vand.u32 2147483648, %v1446_v15  ;;  %vm1627_vm6 = vcmp.eq.f32.partialorder %v1457_v59, inf }
 0x217   : > { %2619 = vrsqrt.f32 %v3260_v27  ;;  %vm1629_vm7 = vcmp.eq.f32.partialorder %v1457_v59, 0.0  ;;  %v1630_v19 = vand.u32 2147483648, %v1457_v59  ;;  %vm1613_vm8 = vcmp.eq.f32.partialorder %v3260_v27, inf }
 0x218   : > { %vm1615_vm9 = vcmp.eq.f32.partialorder %v3260_v27, 0.0  ;;  %v1616_v6 = vand.u32 2147483648, %v3260_v27 }
 0x219   : > { %v2419_v63 = vpop.f32.mrb[36].mxu1 }
 0x21a   : > { %v3263_v34 = vadd.f32 2.0, %v2419_v63  ;;  %v1461_v10 = vpop.f32.mrb[37].mxu1 }
 0x21b   : > { %v3265_v1 = vadd.f32 2.0, %v1461_v10  ;;  %v2420_v22 = vpop.f32.mrb[38].mxu1 }
 0x21c   : > { %2621 = vrsqrt.f32 %v3263_v34  ;;  %v1464_v5 = vpop.f32.mrb[39].mxu1  ;;  %v3271_v31 = vadd.f32 2.0, %v2420_v22  ;;  %vm1648_vm10 = vcmp.eq.f32.partialorder %v3263_v34, inf  ;;  %vm1650_vm11 = vcmp.eq.f32.partialorder %v3263_v34, 0.0 }
 0x21d   : > { %2623 = vrsqrt.f32 %v3265_v1  ;;  %v3273_v13 = vadd.f32 2.0, %v1464_v5  ;;  %v1651_v23 = vand.u32 2147483648, %v3263_v34  ;;  %vm1634_vm12 = vcmp.eq.f32.partialorder %v3265_v1, inf }
 0x21e   : > { %v3269_v18 = vpop.eup %2613  ;;  %2625 = vrsqrt.f32 %v3271_v31  ;;  %vm1636_vm13 = vcmp.eq.f32.partialorder %v3265_v1, 0.0  ;;  %vm1655_vm14 = vcmp.eq.f32.partialorder %v3271_v31, inf  ;;  %vm1657_vm15 = vcmp.eq.f32.partialorder %v3271_v31, 0.0 }
 0x21f   : > { %v3275_v32 = vpop.eup %2615  ;;  %v1619_v44 = vmul.f32 %v3269_v18, %v1454_v52  ;;  %2627 = vrsqrt.f32 %v3273_v13  ;;  %vm1641_vm0 = vcmp.eq.f32.partialorder %v3273_v13, inf  ;;  %vm1643_vm1 = vcmp.eq.f32.partialorder %v3273_v13, 0.0 }
 0x220   : > { %v1605_v37 = vmul.f32 %v3275_v32, %v1446_v15  ;;  %v3286_v46 = vpop.eup %2617 }
 0x221   : > { %v1621_v21 = vsel %vm1620_vm2, %v1454_v52, %v1619_v44  ;;  %v2423_v48 = vpop.f32.mrb[40].mxu1  ;;  %v3292_v51 = vpop.eup %2619  ;;  %v1626_v24 = vmul.f32 %v3286_v46, %v1457_v59  ;;  %v1637_v44 = vand.u32 2147483648, %v3265_v1 }
 0x222   : > { %v1624_v58 = vsel %vm1622_vm3, %v1623_v25, %v1621_v21  ;;  %v1607_v14 = vsel %vm1606_vm4, %v1446_v15, %v1605_v37  ;;  %v1477_v7 = vpop.f32.mrb[41].mxu1  ;;  %v3296_v57 = vadd.f32 2.0, %v2423_v48  ;;  %v1612_v52 = vmul.f32 %v3292_v51, %v3260_v27 }
 0x223   : > { %2629 = vrsqrt.f32 %v1624_v58  ;;  %v1610_v9 = vsel %vm1608_vm5, %v1609_v11, %v1607_v14  ;;  %v2424_v17 = vpop.f32.mrb[42].mxu1  ;;  %v3301_v63 = vadd.f32 2.0, %v1477_v7  ;;  %v1628_v22 = vsel %vm1627_vm6, %v1457_v59, %v1626_v24 }
 0x224   : > { %2631 = vrsqrt.f32 %v1610_v9  ;;  %v1480_v10 = vpop.f32.mrb[43].mxu1  ;;  %v3306_v15 = vadd.f32 2.0, %v2424_v17  ;;  %v1631_v25 = vsel %vm1629_vm7, %v1630_v19, %v1628_v22  ;;  %v1614_v11 = vsel %vm1613_vm8, %v3260_v27, %v1612_v52 }
 0x225   : > { %2633 = vrsqrt.f32 %v3296_v57  ;;  %v1617_v21 = vsel %vm1615_vm9, %v1616_v6, %v1614_v11  ;;  %v1658_v19 = vand.u32 2147483648, %v3271_v31  ;;  %v1644_v9 = vand.u32 2147483648, %v3273_v13 }
 0x226   : > { %v3308_v5 = vpop.eup %2621  ;;  %2635 = vrsqrt.f32 %v3301_v63  ;;  %v3342_v24 = vadd.f32 2.0, %v1480_v10  ;;  %vm1676_vm2 = vcmp.eq.f32.partialorder %v3296_v57, inf  ;;  %vm1678_vm3 = vcmp.eq.f32.partialorder %v3296_v57, 0.0 }
 0x227   : > { %v3316_v37 = vpop.eup %2623  ;;  %2637 = vrsqrt.f32 %v1631_v25  ;;  %v1647_v48 = vmul.f32 %v3308_v5, %v3263_v34  ;;  %vm1662_vm4 = vcmp.eq.f32.partialorder %v3301_v63, inf  ;;  %vm1664_vm5 = vcmp.eq.f32.partialorder %v3301_v63, 0.0 }
 0x228   : > { %2639 = vrsqrt.f32 %v1617_v21  ;;  %v1633_v59 = vmul.f32 %v3316_v37, %v3265_v1  ;;  %v3334_v6 = vpop.eup %2625  ;;  %v1679_v21 = vand.u32 2147483648, %v3296_v57  ;;  %vm1683_vm6 = vcmp.eq.f32.partialorder %v3306_v15, inf }
 0x229   : > { %v1649_v58 = vsel %vm1648_vm10, %v3263_v34, %v1647_v48  ;;  %2641 = vrsqrt.f32 %v3306_v15  ;;  %v2427_v27 = vpop.f32.mrb[44].mxu1  ;;  %v3344_v52 = vpop.eup %2627  ;;  %v1654_v25 = vmul.f32 %v3334_v6, %v3271_v31  ;;  %vm1685_vm7 = vcmp.eq.f32.partialorder %v3306_v15, 0.0 }
 0x22a   : > { %v1652_v14 = vsel %vm1650_vm11, %v1651_v23, %v1649_v58  ;;  %v1635_v7 = vsel %vm1634_vm12, %v3265_v1, %v1633_v59  ;;  %v1493_v17 = vpop.f32.mrb[45].mxu1  ;;  %v3350_v34 = vadd.f32 2.0, %v2427_v27  ;;  %v1640_v10 = vmul.f32 %v3344_v52, %v3273_v13 }
 0x22b   : > { %2643 = vrsqrt.f32 %v1652_v14  ;;  %v1638_v22 = vsel %vm1636_vm13, %v1637_v44, %v1635_v7  ;;  %v2428_v23 = vpop.f32.mrb[46].mxu1  ;;  %v1656_v44 = vsel %vm1655_vm14, %v3271_v31, %v1654_v25  ;;  %v1665_v25 = vand.u32 2147483648, %v3301_v63 }
 0x22c   : > { %2645 = vrsqrt.f32 %v1638_v22  ;;  %v1496_v11 = vpop.f32.mrb[47].mxu1  ;;  %v1659_v58 = vsel %vm1657_vm15, %v1658_v19, %v1656_v44  ;;  %v1642_v27 = vsel %vm1641_vm0, %v3273_v13, %v1640_v10  ;;  %v3389_v13 = vadd.f32 2.0, %v1493_v17 }
 0x22d   : > { %v2630_v1 = vpop.eup %2629  ;;  %2647 = vrsqrt.f32 %v3342_v24  ;;  %v1645_v22 = vsel %vm1643_vm1, %v1644_v9, %v1642_v27  ;;  %vm1669_vm8 = vcmp.eq.f32.partialorder %v3342_v24, inf  ;;  %vm1671_vm9 = vcmp.eq.f32.partialorder %v3342_v24, 0.0 }
 0x22e   : > { %v2632_v48 = vpop.eup %2631  ;;  %v1862_v59 = vmul.f32 %v2630_v1, %v3269_v18  ;;  %2649 = vrsqrt.f32 %v3350_v34  ;;  %vm1704_vm10 = vcmp.eq.f32.partialorder %v3350_v34, inf  ;;  %vm1706_vm11 = vcmp.eq.f32.partialorder %v3350_v34, 0.0 }
 0x22f   : > { %v3373_v14 = vpop.eup %2633  ;;  %v1860_v7 = vmul.f32 %v2632_v48, %v3275_v32  ;;  %2651 = vrsqrt.f32 %v1659_v58  ;;  %v3400_v48 = vadd.f32 2.0, %v2428_v23  ;;  %vm1690_vm12 = vcmp.eq.f32.partialorder %v3389_v13, inf }
 0x230   : > { %v3379_v18 = vpop.eup %2635  ;;  %v1894_v31 = vmul.f32 %v1862_v59, %v3074_v40  ;;  %2653 = vrsqrt.f32 %v1645_v22  ;;  %v1675_v19 = vmul.f32 %v3373_v14, %v3296_v57  ;;  %vm1692_vm13 = vcmp.eq.f32.partialorder %v3389_v13, 0.0 }
 0x231   : > { %v2638_v10 = vpop.eup %2637  ;;  %v1892_v32 = vmul.f32 %v1860_v7, %v3071_v38  ;;  %v1661_v1 = vmul.f32 %v3379_v18, %v3301_v63  ;;  %v2431_v9 = vpop.f32.mrb[48].mxu1  ;;  %2655 = vrsqrt.f32 %v3389_v13  ;;  %vm1711_vm14 = vcmp.eq.f32.partialorder %v3400_v48, inf }
 0x232   : > { %v2640_v44 = vpop.eup %2639  ;;  %1926 = vst [vmem:[%s3392_s20 + $0x10] sm:$0xff] %v1894_v31  ;;  %v1863_v40 = vmul.f32 %v2638_v10, %v3286_v46  ;;  %v1677_v38 = vsel %vm1676_vm2, %v3296_v57, %v1675_v19  ;;  %v3402_v59 = vpop.f32.mrb[49].mxu1  ;;  %v1686_v19 = vand.u32 2147483648, %v3306_v15  ;;  %v3425_v10 = vadd.f32 2.0, %v1496_v11 }
 0x233   : > { %v3404_v17 = vpop.eup %2641  ;;  %1924 = vst [vmem:[%s3392_s20] sm:$0xff] %v1892_v32  ;;  %v1861_v58 = vmul.f32 %v2640_v44, %v3292_v51  ;;  %v1680_v27 = vsel %vm1678_vm3, %v1679_v21, %v1677_v38  ;;  %v1663_v46 = vsel %vm1662_vm4, %v3301_v63, %v1661_v1  ;;  %v3414_v7 = vpop.f32.mrb[50].mxu1  ;;  %v1672_v38 = vand.u32 2147483648, %v3342_v24 }
 0x234   : > { %v1895_v23 = vmul.f32 %v1863_v40, %v3076_v41  ;;  %2657 = vrsqrt.f32 %v1680_v27  ;;  %v1666_v22 = vsel %vm1664_vm5, %v1665_v25, %v1663_v46  ;;  %v1682_v51 = vmul.f32 %v3404_v17, %v3306_v15  ;;  %v3421_v57 = vpop.f32.mrb[51].mxu1 }
 0x235   : > { %v2644_v21 = vpop.eup %2643  ;;  %v1893_v31 = vmul.f32 %v1861_v58, %v3078_v42  ;;  %2659 = vrsqrt.f32 %v1666_v22  ;;  %vm1713_vm15 = vcmp.eq.f32.partialorder %v3400_v48, 0.0  ;;  %vm1697_vm0 = vcmp.eq.f32.partialorder %v3425_v10, inf }
 0x236   : > { %v2646_v32 = vpop.eup %2645  ;;  %1927 = vst [vmem:[%s3392_s20 + $0x18] sm:$0xff] %v1895_v23  ;;  %v1866_v41 = vmul.f32 %v2644_v21, %v3308_v5  ;;  %v1684_v63 = vsel %vm1683_vm6, %v3306_v15, %v1682_v51  ;;  %2661 = vrsqrt.f32 %v3400_v48  ;;  %v3441_v5 = vadd.f32 2.0, %v2431_v9 }
 0x237   : > { %v3434_v25 = vpop.eup %2647  ;;  %1925 = vst [vmem:[%s3392_s20 + $0x8] sm:$0xff] %v1893_v31  ;;  %v1864_v42 = vmul.f32 %v2646_v32, %v3316_v37  ;;  %v1687_v11 = vsel %vm1685_vm7, %v1686_v19, %v1684_v63  ;;  %v3482_v63 = vadd.f32 2.0, %v3402_v59  ;;  %v3497_v59 = vadd.f32 2.0, %v3421_v57 }
 0x238   : > { %v3443_v1 = vpop.eup %2649  ;;  %v1898_v44 = vmul.f32 %v1866_v41, %v3102_v2  ;;  %2663 = vrsqrt.f32 %v1687_v11  ;;  %v1668_v40 = vmul.f32 %v3434_v25, %v3342_v24  ;;  %vm1699_vm1 = vcmp.eq.f32.partialorder %v3425_v10, 0.0 }
 0x239   : > { %v2652_v37 = vpop.eup %2651  ;;  %v1896_v15 = vmul.f32 %v1864_v42, %v3099_v0  ;;  %v1703_v58 = vmul.f32 %v3443_v1, %v3350_v34  ;;  %2665 = vrsqrt.f32 %v3425_v10  ;;  %v2435_v9 = vpop.f32.mrb[52].mxu1  ;;  %v1707_v0 = vand.u32 2147483648, %v3350_v34 }
 0x23a   : > { %v2654_v27 = vpop.eup %2653  ;;  %1930 = vst [vmem:[%s3392_s20 + $0x30] sm:$0xff] %v1898_v44  ;;  %v1867_v2 = vmul.f32 %v2652_v37, %v3334_v6  ;;  %v1670_v46 = vsel %vm1669_vm8, %v3342_v24, %v1668_v40  ;;  %v1525_v23 = vpop.f32.mrb[53].mxu1  ;;  %2667 = vrsqrt.f32 %v3441_v5  ;;  %vm1732_vm2 = vcmp.eq.f32.partialorder %v3441_v5, inf }
 0x23b   : > { %1928 = vst [vmem:[%s3392_s20 + $0x20] sm:$0xff] %v1896_v15  ;;  %v1865_v22 = vmul.f32 %v2654_v27, %v3344_v52  ;;  %v1673_v51 = vsel %vm1671_vm9, %v1672_v38, %v1670_v46  ;;  %v1705_v21 = vsel %vm1704_vm10, %v3350_v34, %v1703_v58  ;;  %v3467_v6 = vpop.f32.mrb[54].mxu1  ;;  %v3472_v41 = vpop.eup %2655  ;;  %vm1734_vm3 = vcmp.eq.f32.partialorder %v3441_v5, 0.0 }
 0x23c   : > { %v1899_v31 = vmul.f32 %v1867_v2, %v3104_v3  ;;  %2669 = vrsqrt.f32 %v1673_v51  ;;  %v1708_v19 = vsel %vm1706_vm11, %v1707_v0, %v1705_v21  ;;  %v3470_v32 = vpop.f32.mrb[55].mxu1  ;;  %v1689_v34 = vmul.f32 %v3472_v41, %v3389_v13 }
 0x23d   : > { %v1897_v52 = vmul.f32 %v1865_v22, %v3106_v4  ;;  %2671 = vrsqrt.f32 %v1708_v19  ;;  %v1693_v3 = vand.u32 2147483648, %v3389_v13  ;;  %v3489_v4 = vadd.f32 2.0, %v3414_v7 }
 0x23e   : > { %v2658_v24 = vpop.eup %2657  ;;  %1931 = vst [vmem:[%s3392_s20 + $0x38] sm:$0xff] %v1899_v31  ;;  %v1691_v38 = vsel %vm1690_vm12, %v3389_v13, %v1689_v34  ;;  %2673 = vrsqrt.f32 %v3482_v63  ;;  %v1714_v7 = vand.u32 2147483648, %v3400_v48  ;;  %v3505_v13 = vadd.f32 2.0, %v2435_v9 }
 0x23f   : > { %v2660_v42 = vpop.eup %2659  ;;  %1929 = vst [vmem:[%s3392_s20 + $0x28] sm:$0xff] %v1897_v52  ;;  %v1870_v11 = vmul.f32 %v2658_v24, %v3373_v14  ;;  %v1694_v37 = vsel %vm1692_vm13, %v1693_v3, %v1691_v38  ;;  %v3533_v31 = vadd.f32 2.0, %v1525_v23  ;;  %v1735_v34 = vand.u32 2147483648, %v3441_v5 }
 0x240   : > { %v3491_v44 = vpop.eup %2661  ;;  %v1868_v40 = vmul.f32 %v2660_v42, %v3379_v18  ;;  %2675 = vrsqrt.f32 %v1694_v37  ;;  %v3548_v3 = vadd.f32 2.0, %v3467_v6  ;;  %vm1718_vm4 = vcmp.eq.f32.partialorder %v3482_v63, inf }
 0x241   : > { %v1902_v14 = vmul.f32 %v1870_v11, %v3126_v49  ;;  %v1710_v15 = vmul.f32 %v3491_v44, %v3400_v48  ;;  %v2439_v58 = vpop.f32.mrb[56].mxu1  ;;  %2677 = vrsqrt.f32 %v3489_v4  ;;  %vm1720_vm5 = vcmp.eq.f32.partialorder %v3482_v63, 0.0 }
 0x242   : > { %v2664_v27 = vpop.eup %2663  ;;  %v1900_v18 = vmul.f32 %v1868_v40, %v3123_v47  ;;  %v3507_v57 = vpop.f32.mrb[57].mxu1  ;;  %2679 = vrsqrt.f32 %v3497_v59  ;;  %vm1739_vm6 = vcmp.eq.f32.partialorder %v3489_v4, inf  ;;  %vm1741_vm7 = vcmp.eq.f32.partialorder %v3489_v4, 0.0 }
 0x243   : > { %v3509_v2 = vpop.eup %2665  ;;  %1934 = vst [vmem:[%s3392_s20 + $0x50] sm:$0xff] %v1902_v14  ;;  %v1871_v49 = vmul.f32 %v2664_v27, %v3404_v17  ;;  %v1712_v46 = vsel %vm1711_vm14, %v3400_v48, %v1710_v15  ;;  %v3518_v47 = vpop.f32.mrb[58].mxu1  ;;  %v1700_v17 = vand.u32 2147483648, %v3425_v10  ;;  %v1742_v14 = vand.u32 2147483648, %v3489_v4 }
 0x244   : > { %1932 = vst [vmem:[%s3392_s20 + $0x40] sm:$0xff] %v1900_v18  ;;  %v1715_v9 = vsel %vm1713_vm15, %v1714_v7, %v1712_v46  ;;  %v1696_v0 = vmul.f32 %v3509_v2, %v3425_v10  ;;  %v3527_v22 = vpop.f32.mrb[59].mxu1  ;;  %v3529_v51 = vpop.eup %2667  ;;  %vm1725_vm8 = vcmp.eq.f32.partialorder %v3497_v59, inf  ;;  %vm1727_vm9 = vcmp.eq.f32.partialorder %v3497_v59, 0.0 }
 0x245   : > { %v1903_v21 = vmul.f32 %v1871_v49, %v3128_v50  ;;  %2681 = vrsqrt.f32 %v1715_v9  ;;  %v1731_v52 = vmul.f32 %v3529_v51, %v3441_v5  ;;  %v3577_v15 = vadd.f32 2.0, %v3470_v32 }
 0x246   : > { %v2670_v48 = vpop.eup %2669  ;;  %v1698_v19 = vsel %vm1697_vm0, %v3425_v10, %v1696_v0  ;;  %2683 = vrsqrt.f32 %v3505_v13  ;;  %v3579_v7 = vadd.f32 2.0, %v2439_v58  ;;  %v1728_v9 = vand.u32 2147483648, %v3497_v59 }
 0x247   : > { %v2672_v24 = vpop.eup %2671  ;;  %1935 = vst [vmem:[%s3392_s20 + $0x58] sm:$0xff] %v1903_v21  ;;  %v1869_v50 = vmul.f32 %v2670_v48, %v3434_v25  ;;  %v1701_v23 = vsel %vm1699_vm1, %v1700_v17, %v1698_v19  ;;  %v1733_v11 = vsel %vm1732_vm2, %v3441_v5, %v1731_v52  ;;  %vm1760_vm10 = vcmp.eq.f32.partialorder %v3505_v13, inf }
 0x248   : > { %v1874_v42 = vmul.f32 %v2672_v24, %v3443_v1  ;;  %2685 = vrsqrt.f32 %v1701_v23  ;;  %v1736_v38 = vsel %vm1734_vm3, %v1735_v34, %v1733_v11  ;;  %v3558_v25 = vpop.eup %2673  ;;  %v1721_v1 = vand.u32 2147483648, %v3482_v63 }
 0x249   : > { %v1901_v40 = vmul.f32 %v1869_v50, %v3130_v8  ;;  %2687 = vrsqrt.f32 %v3533_v31  ;;  %v3556_v10 = vpop.f32.mrb[60].mxu1  ;;  %v1717_v8 = vmul.f32 %v3558_v25, %v3482_v63  ;;  %vm1762_vm11 = vcmp.eq.f32.partialorder %v3505_v13, 0.0 }
 0x24a   : > { %v1906_v6 = vmul.f32 %v1874_v42, %v3150_v28  ;;  %2689 = vrsqrt.f32 %v1736_v38  ;;  %v3563_v5 = vpop.f32.mrb[61].mxu1  ;;  %v2676_v28 = vpop.eup %2675  ;;  %v1763_v48 = vand.u32 2147483648, %v3505_v13  ;;  %v3611_v24 = vadd.f32 2.0, %v3507_v57 }
 0x24b   : > { %1933 = vst [vmem:[%s3392_s20 + $0x48] sm:$0xff] %v1901_v40  ;;  %2691 = vrsqrt.f32 %v3548_v3  ;;  %v3571_v37 = vpop.f32.mrb[62].mxu1  ;;  %v3583_v18 = vpop.eup %2677  ;;  %v1872_v49 = vmul.f32 %v2676_v28, %v3472_v41  ;;  %v1719_v46 = vsel %vm1718_vm4, %v3482_v63, %v1717_v8  ;;  %vm1746_vm12 = vcmp.eq.f32.partialorder %v3533_v31, inf }
 0x24c   : > { %1938 = vst [vmem:[%s3392_s20 + $0x70] sm:$0xff] %v1906_v6  ;;  %v3581_v27 = vpop.f32.mrb[63].mxu1  ;;  %v3591_v0 = vpop.eup %2679  ;;  %v1722_v32 = vsel %vm1720_vm5, %v1721_v1, %v1719_v46  ;;  %v1738_v58 = vmul.f32 %v3583_v18, %v3489_v4  ;;  %2693 = vrsqrt.f32 %v3577_v15  ;;  %vm1748_vm13 = vcmp.eq.f32.partialorder %v3533_v31, 0.0 }
 0x24d   : > { %v1904_v17 = vmul.f32 %v1872_v49, %v3147_v26  ;;  %2695 = vrsqrt.f32 %v1722_v32  ;;  %v1724_v21 = vmul.f32 %v3591_v0, %v3497_v59  ;;  %v1749_v38 = vand.u32 2147483648, %v3533_v31 }
 0x24e   : > { %v1740_v52 = vsel %vm1739_vm6, %v3489_v4, %v1738_v58  ;;  %2697 = vrsqrt.f32 %v3579_v7  ;;  %v3626_v4 = vadd.f32 2.0, %v3518_v47  ;;  %v3647_v8 = vadd.f32 2.0, %v3527_v22 }
 0x24f   : > { %v2682_v41 = vpop.eup %2681  ;;  %1936 = vst [vmem:[%s3392_s20 + $0x60] sm:$0xff] %v1904_v17  ;;  %v1743_v26 = vsel %vm1741_vm7, %v1742_v14, %v1740_v52  ;;  %v1726_v50 = vsel %vm1725_vm8, %v3497_v59, %v1724_v21  ;;  %vm1767_vm14 = vcmp.eq.f32.partialorder %v3548_v3, inf  ;;  %vm1769_vm15 = vcmp.eq.f32.partialorder %v3548_v3, 0.0 }
 0x250   : > { %v3603_v19 = vpop.eup %2683  ;;  %v1875_v63 = vmul.f32 %v2682_v41, %v3491_v44  ;;  %2699 = vrsqrt.f32 %v1743_v26  ;;  %v1729_v57 = vsel %vm1727_vm9, %v1728_v9, %v1726_v50  ;;  %v1770_v22 = vand.u32 2147483648, %v3548_v3 }
 0x251   : > { %v1759_v44 = vmul.f32 %v3603_v19, %v3505_v13  ;;  %2701 = vrsqrt.f32 %v1729_v57  ;;  %vm1753_vm0 = vcmp.eq.f32.partialorder %v3577_v15, inf  ;;  %vm1755_vm1 = vcmp.eq.f32.partialorder %v3577_v15, 0.0 }
 0x252   : > { %v2686_v23 = vpop.eup %2685  ;;  %v1907_v34 = vmul.f32 %v1875_v63, %v3152_v29  ;;  %2703 = vrsqrt.f32 %v3611_v24  ;;  %vm1788_vm2 = vcmp.eq.f32.partialorder %v3579_v7, inf  ;;  %vm1790_vm3 = vcmp.eq.f32.partialorder %v3579_v7, 0.0 }
 0x253   : > { %v3628_v42 = vpop.eup %2687  ;;  %v1873_v11 = vmul.f32 %v2686_v23, %v3509_v2  ;;  %v1761_v40 = vsel %vm1760_vm10, %v3505_v13, %v1759_v44  ;;  %v3684_v21 = vadd.f32 2.0, %v3563_v5  ;;  %v3694_v44 = vadd.f32 2.0, %v3571_v37 }
 0x254   : > { %v2690_v29 = vpop.eup %2689  ;;  %1939 = vst [vmem:[%s3392_s20 + $0x78] sm:$0xff] %v1907_v34  ;;  %v1764_v59 = vsel %vm1762_vm11, %v1763_v48, %v1761_v40  ;;  %v1745_v47 = vmul.f32 %v3628_v42, %v3533_v31  ;;  %vm1774_vm4 = vcmp.eq.f32.partialorder %v3611_v24, inf  ;;  %vm1776_vm5 = vcmp.eq.f32.partialorder %v3611_v24, 0.0 }
 0x255   : > { %v3642_v2 = vpop.eup %2691  ;;  %v1905_v6 = vmul.f32 %v1873_v11, %v3154_v12  ;;  %v1878_v1 = vmul.f32 %v2690_v29, %v3529_v51  ;;  %2705 = vrsqrt.f32 %v1764_v59  ;;  %vm1795_vm6 = vcmp.eq.f32.partialorder %v3626_v4, inf }
 0x256   : > { %v1747_v13 = vsel %vm1746_vm12, %v3533_v31, %v1745_v47  ;;  %v1766_v14 = vmul.f32 %v3642_v2, %v3548_v3  ;;  %2707 = vrsqrt.f32 %v3626_v4  ;;  %v3662_v28 = vpop.eup %2693  ;;  %v1756_v31 = vand.u32 2147483648, %v3577_v15 }
 0x257   : > { %1937 = vst [vmem:[%s3392_s20 + $0x68] sm:$0xff] %v1905_v6  ;;  %v1910_v12 = vmul.f32 %v1878_v1, %v3174_v55  ;;  %v1750_v51 = vsel %vm1748_vm13, %v1749_v38, %v1747_v13  ;;  %v2696_v46 = vpop.eup %2695  ;;  %v1752_v55 = vmul.f32 %v3662_v28, %v3577_v15  ;;  %vm1797_vm7 = vcmp.eq.f32.partialorder %v3626_v4, 0.0 }
 0x258   : > { %2709 = vrsqrt.f32 %v1750_v51  ;;  %v1768_v49 = vsel %vm1767_vm14, %v3548_v3, %v1766_v14  ;;  %v3672_v32 = vpop.eup %2697  ;;  %v1876_v58 = vmul.f32 %v2696_v46, %v3558_v25  ;;  %v3677_v3 = vadd.f32 2.0, %v3556_v10 }
 0x259   : > { %1942 = vst [vmem:[%s3392_s20 + $0x90] sm:$0xff] %v1910_v12  ;;  %v1771_v9 = vsel %vm1769_vm15, %v1770_v22, %v1768_v49  ;;  %2711 = vrsqrt.f32 %v3647_v8  ;;  %v1754_v41 = vsel %vm1753_vm0, %v3577_v15, %v1752_v55  ;;  %v1787_v17 = vmul.f32 %v3672_v32, %v3579_v7 }
 0x25a   : > { %2713 = vrsqrt.f32 %v1771_v9  ;;  %v2700_v48 = vpop.eup %2699  ;;  %v1908_v25 = vmul.f32 %v1876_v58, %v3171_v54  ;;  %v1757_v63 = vsel %vm1755_vm1, %v1756_v31, %v1754_v41  ;;  %v1791_v10 = vand.u32 2147483648, %v3579_v7 }
 0x25b   : > { %2715 = vrsqrt.f32 %v3677_v3  ;;  %v2702_v52 = vpop.eup %2701  ;;  %v1879_v26 = vmul.f32 %v2700_v48, %v3583_v18  ;;  %v1789_v50 = vsel %vm1788_vm2, %v3579_v7, %v1787_v17  ;;  %v1798_v29 = vand.u32 2147483648, %v3626_v4 }
 0x25c   : > { %2717 = vrsqrt.f32 %v1757_v63  ;;  %v3696_v5 = vpop.eup %2703  ;;  %1940 = vst [vmem:[%s3392_s20 + $0x80] sm:$0xff] %v1908_v25  ;;  %v1877_v54 = vmul.f32 %v2702_v52, %v3591_v0  ;;  %v1792_v15 = vsel %vm1790_vm3, %v1791_v10, %v1789_v50  ;;  %v1777_v0 = vand.u32 2147483648, %v3611_v24 }
 0x25d   : > { %2719 = vrsqrt.f32 %v3684_v21  ;;  %v1911_v34 = vmul.f32 %v1879_v26, %v3176_v56  ;;  %v1773_v7 = vmul.f32 %v3696_v5, %v3611_v24  ;;  %v3726_v38 = vadd.f32 2.0, %v3581_v27 }
 0x25e   : > { %2721 = vrsqrt.f32 %v1792_v15  ;;  %v1909_v18 = vmul.f32 %v1877_v54, %v3178_v16  ;;  %vm1781_vm8 = vcmp.eq.f32.partialorder %v3647_v8, inf  ;;  %vm1783_vm9 = vcmp.eq.f32.partialorder %v3647_v8, 0.0 }
 0x25f   : > { %v2706_v23 = vpop.eup %2705  ;;  %1943 = vst [vmem:[%s3392_s20 + $0x98] sm:$0xff] %v1911_v34  ;;  %v1775_v11 = vsel %vm1774_vm4, %v3611_v24, %v1773_v7  ;;  %2723 = vrsqrt.f32 %v3694_v44  ;;  %vm1816_vm10 = vcmp.eq.f32.partialorder %v3677_v3, inf  ;;  %v1819_v46 = vand.u32 2147483648, %v3677_v3 }
 0x260   : > { %v3705_v37 = vpop.eup %2707  ;;  %v1882_v57 = vmul.f32 %v2706_v23, %v3603_v19  ;;  %1941 = vst [vmem:[%s3392_s20 + $0x88] sm:$0xff] %v1909_v18  ;;  %v1778_v19 = vsel %vm1776_vm5, %v1777_v0, %v1775_v11  ;;  %vm1818_vm11 = vcmp.eq.f32.partialorder %v3677_v3, 0.0  ;;  %vm1802_vm12 = vcmp.eq.f32.partialorder %v3684_v21, inf }
 0x261   : > { %v1794_v56 = vmul.f32 %v3705_v37, %v3626_v4  ;;  %2725 = vrsqrt.f32 %v1778_v19  ;;  %v1805_v58 = vand.u32 2147483648, %v3684_v21  ;;  %vm1804_vm13 = vcmp.eq.f32.partialorder %v3684_v21, 0.0 }
 0x262   : > { %v2710_v40 = vpop.eup %2709  ;;  %v1914_v16 = vmul.f32 %v1882_v57, %v3198_v35  ;;  %vm1823_vm14 = vcmp.eq.f32.partialorder %v3694_v44, inf  ;;  %vm1825_vm15 = vcmp.eq.f32.partialorder %v3694_v44, 0.0  ;;  %vm1809_vm0 = vcmp.eq.f32.partialorder %v3726_v38, inf }
 0x263   : > { %v3721_v59 = vpop.eup %2711  ;;  %v1880_v24 = vmul.f32 %v2710_v40, %v3628_v42  ;;  %v1796_v47 = vsel %vm1795_vm6, %v3626_v4, %v1794_v56  ;;  %v1784_v42 = vand.u32 2147483648, %v3647_v8  ;;  %vm1811_vm1 = vcmp.eq.f32.partialorder %v3726_v38, 0.0 }
 0x264   : > { %v2714_v6 = vpop.eup %2713  ;;  %1946 = vst [vmem:[%s3392_s20 + $0xb0] sm:$0xff] %v1914_v16  ;;  %v1799_v1 = vsel %vm1797_vm7, %v1798_v29, %v1796_v47  ;;  %v1780_v35 = vmul.f32 %v3721_v59, %v3647_v8 }
 0x265   : > { %v1912_v13 = vmul.f32 %v1880_v24, %v3195_v33  ;;  %v1883_v14 = vmul.f32 %v2714_v6, %v3642_v2  ;;  %2727 = vrsqrt.f32 %v1799_v1  ;;  %v2716_v4 = vpop.eup %2715 }
 0x266   : > { %v1782_v27 = vsel %vm1781_vm8, %v3647_v8, %v1780_v35  ;;  %2729 = vrsqrt.f32 %v3726_v38  ;;  %v2718_v12 = vpop.eup %2717  ;;  %v1815_v33 = vmul.f32 %v2716_v4, %v3677_v3 }
 0x267   : > { %1944 = vst [vmem:[%s3392_s20 + $0xa0] sm:$0xff] %v1912_v13  ;;  %v1915_v51 = vmul.f32 %v1883_v14, %v3200_v36  ;;  %v1785_v22 = vsel %vm1783_vm9, %v1784_v42, %v1782_v27  ;;  %v2720_v49 = vpop.eup %2719  ;;  %v1881_v2 = vmul.f32 %v2718_v12, %v3662_v28 }
 0x268   : > { %2731 = vrsqrt.f32 %v1785_v22  ;;  %v2722_v9 = vpop.eup %2721  ;;  %v1817_v8 = vsel %vm1816_vm10, %v3677_v3, %v1815_v33  ;;  %v1801_v36 = vmul.f32 %v2720_v49, %v3684_v21 }
 0x269   : > { %1947 = vst [vmem:[%s3392_s20 + $0xb8] sm:$0xff] %v1915_v51  ;;  %v1913_v55 = vmul.f32 %v1881_v2, %v3202_v20  ;;  %v1886_v28 = vmul.f32 %v2722_v9, %v3672_v32  ;;  %v1820_v31 = vsel %vm1818_vm11, %v1819_v46, %v1817_v8  ;;  %v2724_v41 = vpop.eup %2723  ;;  %v1826_v20 = vand.u32 2147483648, %v3694_v44 }
 0x26a   : > { %2733 = vrsqrt.f32 %v1820_v31  ;;  %v1803_v17 = vsel %vm1802_vm12, %v3684_v21, %v1801_v36  ;;  %v1822_v25 = vmul.f32 %v2724_v41, %v3694_v44 }
 0x26b   : > { %1945 = vst [vmem:[%s3392_s20 + $0xa8] sm:$0xff] %v1913_v55  ;;  %v1918_v3 = vmul.f32 %v1886_v28, %v3222_v61  ;;  %v1806_v48 = vsel %vm1804_vm13, %v1805_v58, %v1803_v17  ;;  %v2726_v63 = vpop.eup %2725 }
 0x26c   : > { %2735 = vrsqrt.f32 %v1806_v48  ;;  %v1884_v32 = vmul.f32 %v2726_v63, %v3696_v5  ;;  %v1824_v10 = vsel %vm1823_vm14, %v3694_v44, %v1822_v25  ;;  %v1812_v44 = vand.u32 2147483648, %v3726_v38 }
 0x26d   : > { %1950 = vst [vmem:[%s3392_s20 + $0xd0] sm:$0xff] %v1918_v3  ;;  %v1827_v61 = vsel %vm1825_vm15, %v1826_v20, %v1824_v10 }
 0x26e   : > { %v1916_v26 = vmul.f32 %v1884_v32, %v3219_v60  ;;  %2737 = vrsqrt.f32 %v1827_v61 }
 0x26f   : > { %v2728_v21 = vpop.eup %2727 }
 0x270   : > { %v2730_v52 = vpop.eup %2729  ;;  %v1887_v50 = vmul.f32 %v2728_v21, %v3705_v37  ;;  %1948 = vst [vmem:[%s3392_s20 + $0xc0] sm:$0xff] %v1916_v26 }
 0x271   : > { %v1808_v54 = vmul.f32 %v2730_v52, %v3726_v38 }
 0x272   : > { %v2732_v15 = vpop.eup %2731  ;;  %v1919_v5 = vmul.f32 %v1887_v50, %v3224_v62 }
 0x273   : > { %v1885_v23 = vmul.f32 %v2732_v15, %v3721_v59  ;;  %v1810_v34 = vsel %vm1809_vm0, %v3726_v38, %v1808_v54 }
 0x274   : > { %1951 = vst [vmem:[%s3392_s20 + $0xd8] sm:$0xff] %v1919_v5  ;;  %v1813_v60 = vsel %vm1811_vm1, %v1812_v44, %v1810_v34  ;;  %v2734_v7 = vpop.eup %2733 }
 0x275   : > { %v1917_v37 = vmul.f32 %v1885_v23, %v3226_v30  ;;  %2739 = vrsqrt.f32 %v1813_v60  ;;  %v1890_v62 = vmul.f32 %v2734_v7, %v2716_v4 }
 0x276   : > { %v2736_v18 = vpop.eup %2735 }
 0x277   : > { %1949 = vst [vmem:[%s3392_s20 + $0xc8] sm:$0xff] %v1917_v37  ;;  %v1922_v57 = vmul.f32 %v1890_v62, %v3246_v43  ;;  %v1888_v0 = vmul.f32 %v2736_v18, %v2720_v49 }
 0x278   : > { %v2738_v11 = vpop.eup %2737 }
 0x279   : > { %1954 = vst [vmem:[%s3392_s20 + $0xf0] sm:$0xff] %v1922_v57  ;;  %v1920_v56 = vmul.f32 %v1888_v0, %v3243_v39  ;;  %v1891_v40 = vmul.f32 %v2738_v11, %v2724_v41 }
 0x27b   : > { %1952 = vst [vmem:[%s3392_s20 + $0xe0] sm:$0xff] %v1920_v56  ;;  %v1923_v16 = vmul.f32 %v1891_v40, %v3248_v45 }
 0x27d   : > { %1955 = vst [vmem:[%s3392_s20 + $0xf8] sm:$0xff] %v1923_v16 }
 0x27f   : > { %v2740_v30 = vpop.eup %2739 }
 0x280   : > { %v1889_v19 = vmul.f32 %v2740_v30, %v2730_v52 }
 0x282   : > { %v1921_v39 = vmul.f32 %v1889_v19, %v3250_v53 }
 0x284   : > { %1953 = vst [vmem:[%s3392_s20 + $0xe8] sm:$0xff] %v1921_v39 }
 0x285   : > { %2754 = shalt.err (!%p2751_p3)
}
 0x286   : > { %s2755_s8 = scalar_lea.hbm %s3787_s29, 4096  ;;  %s2759_s11 = scalar_lea.hbm %s3840_s4, 8192 }
 0x287   : > { %p2756_p4 = scmp.ne.s32.totalorder %s3787_s29, %s2755_s8  ;;  %p2760_p9 = scmp.lt.u32.totalorder %s3787_s29, %s3840_s4 }
 0x288   : > { %p2761_p10 = scmp.lt.u32.totalorder %s2759_s11, %s2755_s8  ;;  %p2763_p12 = scmp.lt.u32.totalorder %s2755_s8, %s3787_s29 }
 0x289   : > { %p2757_p7 = pnand %p2756_p4, %p2871_p5 }
 0x28a   : > { %p2762_p11 = por %p2761_p10, %p2760_p9 }
 0x28b   : > { %p2758_p8 = pneg %p2757_p7 }
 0x28c   : > { %p2764_p13 = por %p2763_p12, %p2762_p11 }
 0x28e   : > { %p2765_p0 = pnand %p2764_p13, %p2758_p8 }
 0x290   : > { %2768 = shalt.err (!%p2765_p0)
}
 0x291   : > { %s2806_s14 = smov 128   ;;  %s2807_s20 = smov 8  }
 0x292   : > { %2513 = dma.vmem_to_hbm [thread:$0]  (%p2871_p5), %s3789_s23, 4096, %s3787_s29, %s3795_s30, %s2806_s14, %s2806_s14, %s2807_s20  }
 0x293 PF: > { %p2519_p1 = scmp.ge.s32.totalorder %s2803_s18, 2  ;;  %s1985_s22 = sand.u32 1, %s2791_s15  }
 0x294   : > { %s1986_s27 = scalar_lea.sflag [#allocation3], %s1985_s22 }
 0x295   : > { %p2516_p2 = pnand %p2519_p1, %p2875_p6 }
 0x297   : > { %2786 = dma.done.wait (!%p2516_p2), %s1986_s27, 4096  }
 0x298   : > { %2788 = vsyncadd (!%p2516_p2), %s1986_s27, 4294963200  ;;  %p14_p3 = scmp.ge.s32.totalorder %s2858_s21, 4   ;;  %s3843_s15 = smov %s2795_s16 }
 0x299   : > { %s3844_s16 = smov %s2799_s17  ;;  %s3845_s17 = smov %s2869_s24 }
 0x29a   : > { %s3846_s18 = smov %s2858_s21  ;;  %16 = sbr.rel (!%p14_p3) target bundleno = 3 (0x3), region = 75 }
 0x2a1   :  { %1991 = vsyncpa [#allocation3], 1 }
 0x2a2   :  { %1993 = vsyncpa [#allocation3 + $0x1], 1 }

</bundles_post_ra>
